<compile_context>
chip_gen: v6e
topology: v6e:2x2x1
jax: 0.10.0
libtpu: 0.0.40
codegen_flags: <defaults>
</compile_context>

<pallas_src>
import numpy as np
import jax
import jax.numpy as jnp
from jax.experimental import pallas as pl
from jax.experimental.pallas import tpu as pltpu

# ----------------------- module "__init__" configuration -----------------------
SAMPLE_RATE = 16000
N_FFT = 128
WIN_LENGTH = 128
HOP_LENGTH = 32
F_MIN = 0.0
F_MAX = 8000.0
EPS = 1e-5
N_MELS = 128                      # torchaudio MelSpectrogram default n_mels
N_FREQS = N_FFT // 2 + 1          # onesided rfft bins = 65
N_FREQ_PAD = 128                  # pad 65 -> 128 for lane alignment (extra cols zero)
TM_MAX = 1024                     # frame rows (per signal) per grid step


# ----------------------- deterministic parameter setup -------------------------
def _hz_to_mel_slaney(f):
    f = np.asarray(f, dtype=np.float64)
    f_sp = 200.0 / 3
    mels = f / f_sp
    min_log_hz = 1000.0
    min_log_mel = min_log_hz / f_sp
    logstep = np.log(6.4) / 27.0
    return np.where(f >= min_log_hz,
                    min_log_mel + np.log(np.maximum(f, 1e-10) / min_log_hz) / logstep,
                    mels)


def _mel_to_hz_slaney(m):
    m = np.asarray(m, dtype=np.float64)
    f_sp = 200.0 / 3
    freqs = f_sp * m
    min_log_hz = 1000.0
    min_log_mel = min_log_hz / f_sp
    logstep = np.log(6.4) / 27.0
    return np.where(m >= min_log_mel,
                    min_log_hz * np.exp(logstep * (m - min_log_mel)),
                    freqs)


def _melscale_fbanks():
    # matches torchaudio.functional.melscale_fbanks(norm='slaney', mel_scale='slaney')
    all_freqs = np.linspace(0, SAMPLE_RATE // 2, N_FREQS)
    m_min = _hz_to_mel_slaney(F_MIN)
    m_max = _hz_to_mel_slaney(F_MAX)
    m_pts = np.linspace(m_min, m_max, N_MELS + 2)
    f_pts = _mel_to_hz_slaney(m_pts)
    f_diff = f_pts[1:] - f_pts[:-1]
    slopes = f_pts[None, :] - all_freqs[:, None]
    down = -slopes[:, :-2] / f_diff[:-1]
    up = slopes[:, 2:] / f_diff[1:]
    fb = np.maximum(0.0, np.minimum(down, up))
    enorm = 2.0 / (f_pts[2:N_MELS + 2] - f_pts[:N_MELS])
    fb = fb * enorm[None, :]                           # (n_freqs, n_mels)
    fb_pad = np.zeros((N_FREQ_PAD, N_MELS), dtype=np.float64)
    fb_pad[:N_FREQS] = fb
    return fb_pad


def _windowed_dft_mat():
    """Fused [W*cos | -W*sin] windowed-DFT matrix: (n_fft, 2*N_FREQ_PAD)."""
    n = np.arange(N_FFT)
    # periodic hann window (torch.hann_window default), win_length == n_fft
    w = 0.5 - 0.5 * np.cos(2.0 * np.pi * n / WIN_LENGTH)
    k = np.arange(N_FREQS)
    ang = 2.0 * np.pi * np.outer(n, k) / N_FFT
    m = np.zeros((N_FFT, 2 * N_FREQ_PAD), dtype=np.float64)
    m[:, :N_FREQS] = w[:, None] * np.cos(ang)
    m[:, N_FREQ_PAD:N_FREQ_PAD + N_FREQS] = -(w[:, None] * np.sin(ang))
    return m


# bf16 DFT matrix (frames are bf16, MXU accumulates f32); mel fbank kept f32 so the
# mag -> mel -> log path matches the f32 torch reference more closely (not a bottleneck).
COSSIN_MAT = jnp.asarray(_windowed_dft_mat(), dtype=jnp.bfloat16)   # (128, 256)
MEL_FB = jnp.asarray(_melscale_fbanks(), dtype=jnp.float32)         # (128, 128)


# --------------------------------- Pallas kernel --------------------------------
def _mel_loss_kernel(ft_ref, fp_ref, cossin_ref, fb_ref, st_ref, sp_ref, lsum_ref):
    cossin = cossin_ref[...]          # (128, 256) bf16
    fb = fb_ref[...]                  # (128, 128) f32

    def log_mel_t(frames):
        # frames: (tm, n_fft) bf16.  Single fused windowed-DFT matmul;
        # columns [0,128)=Re, [128,256)=Im.
        spec = jnp.dot(frames, cossin, preferred_element_type=jnp.float32)
        re = spec[:, :N_FREQ_PAD]
        im = spec[:, N_FREQ_PAD:]
        # power=1 magnitude; tiny eps keeps the gradient finite at exactly zero and
        # is far below the 1e-5 clamp, so forward values are unchanged.
        mag = jnp.sqrt(re * re + im * im + 1e-24)
        mel = jnp.dot(mag, fb, preferred_element_type=jnp.float32)   # f32 mel path
        s = jnp.log(jnp.maximum(mel, EPS))                           # (tm, n_mels) f32
        return s.T                                                   # (n_mels, tm)

    # Two dots against the same RHS weights instead of concatenating tiles
    # (same MXU cycles, no VMEM copy on the vector-store/load slots).
    st = log_mel_t(ft_ref[0])
    sp = log_mel_t(fp_ref[0])

    # mel-major, bf16 spectrogram outputs (halves output HBM bytes / vst count).
    st_ref[0] = st.astype(st_ref.dtype)
    sp_ref[0] = sp.astype(sp_ref.dtype)

    # Lane-dense per-frame partial L1 sums (f32, pre-quantization values); sublane
    # reduce rides the XLU.  No resident accumulator -> grid stays fully parallel.
    lsum_ref[0] = jnp.sum(jnp.abs(st - sp), axis=0, keepdims=True)


def _run_kernel(ft, fp, tm):
    B, f_pad, _ = ft.shape
    grid = (B, f_pad // tm)

    frame_spec = pl.BlockSpec((1, tm, N_FFT), lambda b, i: (b, i, 0))
    cossin_spec = pl.BlockSpec((N_FFT, 2 * N_FREQ_PAD), lambda b, i: (0, 0))
    fb_spec = pl.BlockSpec((N_FREQ_PAD, N_MELS), lambda b, i: (0, 0))
    out_spec = pl.BlockSpec((1, N_MELS, tm), lambda b, i: (b, 0, i))
    lsum_spec = pl.BlockSpec((1, 1, tm), lambda b, i: (b, 0, i))

    rows = 2 * B * f_pad                                       # true + pred frame rows
    flops = (2 * rows * N_FFT * (2 * N_FREQ_PAD)               # fused DFT matmul
             + 2 * rows * N_FREQ_PAD * N_MELS)                 # mel projection
    transcendentals = rows * (N_FREQ_PAD + N_MELS)             # sqrt + log
    bytes_accessed = (rows * N_FFT * 2                         # bf16 frame inputs
                      + N_FFT * 2 * N_FREQ_PAD * 2             # bf16 DFT matrix
                      + N_FREQ_PAD * N_MELS * 4                # f32 mel fbank
                      + rows * N_MELS * 2                      # bf16 spectrogram out
                      + B * f_pad * 4)                         # f32 lsum row out

    return pl.pallas_call(
        _mel_loss_kernel,
        out_shape=(
            jax.ShapeDtypeStruct((B, N_MELS, f_pad), jnp.bfloat16),
            jax.ShapeDtypeStruct((B, N_MELS, f_pad), jnp.bfloat16),
            jax.ShapeDtypeStruct((B, 1, f_pad), jnp.float32),
        ),
        grid=grid,
        in_specs=[frame_spec, frame_spec, cossin_spec, fb_spec],
        out_specs=(out_spec, out_spec, lsum_spec),
        compiler_params=pltpu.CompilerParams(
            dimension_semantics=("parallel", "parallel"),
            vmem_limit_bytes=32 * 1024 * 1024),
        cost_estimate=pl.CostEstimate(flops=flops,
                                      transcendentals=transcendentals,
                                      bytes_accessed=bytes_accessed),
    )(ft, fp, COSSIN_MAT, MEL_FB)


# --------------------------------- JAX glue --------------------------------------
def _round_up(x, m):
    return ((x + m - 1) // m) * m


def _frame(x):
    """Reflect-pad (loss pad + STFT center pad) and extract overlapping frames
    via 4 strided slices + concat (hop divides n_fft) — no XLA gather.
    Done in bf16 so the 4x frame expansion costs half the HBM traffic."""
    pad1 = (N_FFT - HOP_LENGTH) // 2
    x = x.astype(jnp.bfloat16)
    x = jnp.pad(x, ((0, 0), (pad1, pad1)), mode="reflect")
    x = jnp.pad(x, ((0, 0), (N_FFT // 2, N_FFT // 2)), mode="reflect")  # center=True
    B, L = x.shape
    n_frames = 1 + (L - N_FFT) // HOP_LENGTH
    L_pad = _round_up(L, HOP_LENGTH)
    if L_pad != L:
        x = jnp.pad(x, ((0, 0), (0, L_pad - L)))
    chunks = x.reshape(B, L_pad // HOP_LENGTH, HOP_LENGTH)
    parts = [chunks[:, k:k + n_frames] for k in range(N_FFT // HOP_LENGTH)]
    frames = jnp.concatenate(parts, axis=-1)                 # (B, F, n_fft)
    return frames, n_frames


def _pick_tm(B, F):
    """Frame-tile rows: always a multiple of 128 (aligned blocks / cheap in-kernel
    transpose); when B == 1 split the frame axis so v7x's 2 TensorCores share work."""
    if B == 1 and F > 128:
        tm = _round_up(-(-F // 2), 128)
    else:
        tm = _round_up(F, 128)
    return min(TM_MAX, max(128, tm))


def mel_loss(x_true, x_pred):
    B = x_true.shape[0]
    ft, n_frames = _frame(x_true)
    fp, _ = _frame(x_pred)
    F = n_frames

    tm = _pick_tm(B, F)
    f_pad = _round_up(F, tm)
    if f_pad != F:   # zero-padded frames -> identical log(eps) rows -> contribute 0
        ft = jnp.pad(ft, ((0, 0), (0, f_pad - F), (0, 0)))
        fp = jnp.pad(fp, ((0, 0), (0, f_pad - F), (0, 0)))

    st, sp, lsum = _run_kernel(ft, fp, tm)

    # Kernel already emits the (B, n_mels, frames) layout -> only a trailing slice.
    S_true = st[:, :, :F]
    S_pred = sp[:, :, :F]
    # Padded frame columns of lsum are exactly 0 (identical clamped rows), so the
    # plain sum equals the sum over valid frames.
    loss = jnp.sum(lsum) / (B * F * N_MELS)
    return loss, S_true, S_pred


if __name__ == "__main__":
    key = jax.random.PRNGKey(0)
    k1, k2 = jax.random.split(key)
    x_true = jax.random.normal(k1, (2, 256), dtype=jnp.float32)
    x_pred = jax.random.normal(k2, (2, 256), dtype=jnp.float32)
    loss, S_true, S_pred = jax.jit(mel_loss)(x_true, x_pred)
    jax.block_until_ready((loss, S_true, S_pred))
    assert S_true.shape == (2, N_MELS, 12) and S_pred.shape == (2, N_MELS, 12)
    assert jnp.isfinite(loss)
    print("KERNEL_OK")
</pallas_src>

<mosaic_0001>
module attributes {stable_mosaic.version = 11 : i64} {
  func.func @_mel_loss_kernel(%arg0: i32, %arg1: i32, %arg2: memref<1x128x128xbf16, #tpu.memory_space<vmem>>, %arg3: memref<1x128x128xbf16, #tpu.memory_space<vmem>>, %arg4: memref<128x256xbf16, #tpu.memory_space<vmem>>, %arg5: memref<128x128xf32, #tpu.memory_space<vmem>>, %arg6: memref<1x128x128xbf16, #tpu.memory_space<vmem>>, %arg7: memref<1x128x128xbf16, #tpu.memory_space<vmem>>, %arg8: memref<1x1x128xf32, #tpu.memory_space<vmem>>) attributes {dimension_semantics = [#tpu.dimension_semantics<parallel>, #tpu.dimension_semantics<parallel>], iteration_bounds = array<i64: 2, 1>, scalar_prefetch = 0 : i64, scratch_operands = 0 : i64, tpu.core_type = #tpu.core_type<tc>, window_params = [{transform_indices = @transform_0, window_bounds = array<i64: 1, 128, 128>}, {transform_indices = @transform_1, window_bounds = array<i64: 1, 128, 128>}, {pipeline_mode = #tpu.pipeline_mode<synchronous>, transform_indices = @transform_2, window_bounds = array<i64: 128, 256>}, {pipeline_mode = #tpu.pipeline_mode<synchronous>, transform_indices = @transform_3, window_bounds = array<i64: 128, 128>}, {transform_indices = @transform_4, window_bounds = array<i64: 1, 128, 128>}, {transform_indices = @transform_5, window_bounds = array<i64: 1, 128, 128>}, {transform_indices = @transform_6, window_bounds = array<i64: 1, 1, 128>}]} {
    %c0 = arith.constant 0 : index
    %c0_0 = arith.constant 0 : index
    %0 = vector.load %arg4[%c0, %c0_0] : memref<128x256xbf16, #tpu.memory_space<vmem>>, vector<128x256xbf16>
    %c0_1 = arith.constant 0 : index
    %c0_2 = arith.constant 0 : index
    %1 = vector.load %arg5[%c0_1, %c0_2] : memref<128x128xf32, #tpu.memory_space<vmem>>, vector<128x128xf32>
    %c0_3 = arith.constant 0 : index
    %c0_4 = arith.constant 0 : index
    %c0_5 = arith.constant 0 : index
    %2 = vector.load %arg2[%c0_3, %c0_4, %c0_5] : memref<1x128x128xbf16, #tpu.memory_space<vmem>>, vector<1x128x128xbf16>
    %3 = vector.shape_cast %2 : vector<1x128x128xbf16> to vector<128x128xbf16>
    %cst = arith.constant dense<0.000000e+00> : vector<128x256xf32>
    %4 = tpu.matmul %3, %0, %cst {dimension_numbers = #tpu.dot_dimension_numbers<[1], [0], [0], [1], [0, 0, 1, 1], [], []>} : vector<128x128xbf16>, vector<128x256xbf16>, vector<128x256xf32> -> vector<128x256xf32>
    %5 = vector.extract_strided_slice %4 {offsets = [0, 0], sizes = [128, 128], strides = [1, 1]} : vector<128x256xf32> to vector<128x128xf32>
    %6 = vector.extract_strided_slice %4 {offsets = [0, 128], sizes = [128, 128], strides = [1, 1]} : vector<128x256xf32> to vector<128x128xf32>
    %7 = arith.mulf %5, %5 : vector<128x128xf32>
    %8 = arith.mulf %6, %6 : vector<128x128xf32>
    %9 = arith.addf %7, %8 : vector<128x128xf32>
    %cst_6 = arith.constant 1.000000e-24 : f32
    %10 = vector.broadcast %cst_6 : f32 to vector<128x128xf32>
    %11 = arith.addf %9, %10 : vector<128x128xf32>
    %12 = math.sqrt %11 : vector<128x128xf32>
    %cst_7 = arith.constant dense<0.000000e+00> : vector<128x128xf32>
    %13 = tpu.matmul %12, %1, %cst_7 {dimension_numbers = #tpu.dot_dimension_numbers<[1], [0], [0], [1], [0, 0, 1, 1], [], []>} : vector<128x128xf32>, vector<128x128xf32>, vector<128x128xf32> -> vector<128x128xf32>
    %cst_8 = arith.constant 9.99999974E-6 : f32
    %14 = vector.broadcast %cst_8 : f32 to vector<128x128xf32>
    %15 = arith.maximumf %13, %14 : vector<128x128xf32>
    %16 = math.log %15 : vector<128x128xf32>
    %17 = tpu.transpose %16, [1, 0] : vector<128x128xf32> -> vector<128x128xf32>
    %c0_9 = arith.constant 0 : index
    %c0_10 = arith.constant 0 : index
    %c0_11 = arith.constant 0 : index
    %18 = vector.load %arg3[%c0_9, %c0_10, %c0_11] : memref<1x128x128xbf16, #tpu.memory_space<vmem>>, vector<1x128x128xbf16>
    %19 = vector.shape_cast %18 : vector<1x128x128xbf16> to vector<128x128xbf16>
    %cst_12 = arith.constant dense<0.000000e+00> : vector<128x256xf32>
    %20 = tpu.matmul %19, %0, %cst_12 {dimension_numbers = #tpu.dot_dimension_numbers<[1], [0], [0], [1], [0, 0, 1, 1], [], []>} : vector<128x128xbf16>, vector<128x256xbf16>, vector<128x256xf32> -> vector<128x256xf32>
    %21 = vector.extract_strided_slice %20 {offsets = [0, 0], sizes = [128, 128], strides = [1, 1]} : vector<128x256xf32> to vector<128x128xf32>
    %22 = vector.extract_strided_slice %20 {offsets = [0, 128], sizes = [128, 128], strides = [1, 1]} : vector<128x256xf32> to vector<128x128xf32>
    %23 = arith.mulf %21, %21 : vector<128x128xf32>
    %24 = arith.mulf %22, %22 : vector<128x128xf32>
    %25 = arith.addf %23, %24 : vector<128x128xf32>
    %cst_13 = arith.constant 1.000000e-24 : f32
    %26 = vector.broadcast %cst_13 : f32 to vector<128x128xf32>
    %27 = arith.addf %25, %26 : vector<128x128xf32>
    %28 = math.sqrt %27 : vector<128x128xf32>
    %cst_14 = arith.constant dense<0.000000e+00> : vector<128x128xf32>
    %29 = tpu.matmul %28, %1, %cst_14 {dimension_numbers = #tpu.dot_dimension_numbers<[1], [0], [0], [1], [0, 0, 1, 1], [], []>} : vector<128x128xf32>, vector<128x128xf32>, vector<128x128xf32> -> vector<128x128xf32>
    %cst_15 = arith.constant 9.99999974E-6 : f32
    %30 = vector.broadcast %cst_15 : f32 to vector<128x128xf32>
    %31 = arith.maximumf %29, %30 : vector<128x128xf32>
    %32 = math.log %31 : vector<128x128xf32>
    %33 = tpu.transpose %32, [1, 0] : vector<128x128xf32> -> vector<128x128xf32>
    %34 = arith.truncf %17 : vector<128x128xf32> to vector<128x128xbf16>
    %c0_16 = arith.constant 0 : index
    %c0_17 = arith.constant 0 : index
    %c0_18 = arith.constant 0 : index
    %35 = vector.load %arg6[%c0_16, %c0_17, %c0_18] : memref<1x128x128xbf16, #tpu.memory_space<vmem>>, vector<1x128x128xbf16>
    %36 = vector.shape_cast %35 : vector<1x128x128xbf16> to vector<128x128xbf16>
    %37 = vector.shape_cast %34 : vector<128x128xbf16> to vector<1x128x128xbf16>
    tpu.vector_store %arg6[%c0_16, %c0_17, %c0_18], %37 {strides = array<i32>} : memref<1x128x128xbf16, #tpu.memory_space<vmem>>, vector<1x128x128xbf16>,
    %38 = arith.truncf %33 : vector<128x128xf32> to vector<128x128xbf16>
    %c0_19 = arith.constant 0 : index
    %c0_20 = arith.constant 0 : index
    %c0_21 = arith.constant 0 : index
    %39 = vector.load %arg7[%c0_19, %c0_20, %c0_21] : memref<1x128x128xbf16, #tpu.memory_space<vmem>>, vector<1x128x128xbf16>
    %40 = vector.shape_cast %39 : vector<1x128x128xbf16> to vector<128x128xbf16>
    %41 = vector.shape_cast %38 : vector<128x128xbf16> to vector<1x128x128xbf16>
    tpu.vector_store %arg7[%c0_19, %c0_20, %c0_21], %41 {strides = array<i32>} : memref<1x128x128xbf16, #tpu.memory_space<vmem>>, vector<1x128x128xbf16>,
    %42 = arith.subf %17, %33 : vector<128x128xf32>
    %43 = math.absf %42 : vector<128x128xf32>
    %cst_22 = arith.constant dense<0.000000e+00> : vector<128xf32>
    %44 = vector.multi_reduction <add>, %43, %cst_22 [0] : vector<128x128xf32> to vector<128xf32>
    %45 = vector.shape_cast %44 : vector<128xf32> to vector<1x128xf32>
    %c0_23 = arith.constant 0 : index
    %c0_24 = arith.constant 0 : index
    %c0_25 = arith.constant 0 : index
    %46 = vector.load %arg8[%c0_23, %c0_24, %c0_25] : memref<1x1x128xf32, #tpu.memory_space<vmem>>, vector<1x1x128xf32>
    %47 = vector.shape_cast %46 : vector<1x1x128xf32> to vector<1x128xf32>
    %48 = vector.shape_cast %45 : vector<1x128xf32> to vector<1x1x128xf32>
    tpu.vector_store %arg8[%c0_23, %c0_24, %c0_25], %48 {strides = array<i32>} : memref<1x1x128xf32, #tpu.memory_space<vmem>>, vector<1x1x128xf32>,
    return
  }
  func.func @transform_0(%arg0: i32, %arg1: i32) -> (i32, i32, i32) {
    %c0_i32 = arith.constant 0 : i32
    %c0_i32_0 = arith.constant 0 : i32
    return %arg0, %arg1, %c0_i32 : i32, i32, i32
  }
  func.func @transform_1(%arg0: i32, %arg1: i32) -> (i32, i32, i32) {
    %c0_i32 = arith.constant 0 : i32
    %c0_i32_0 = arith.constant 0 : i32
    return %arg0, %arg1, %c0_i32 : i32, i32, i32
  }
  func.func @transform_2(%arg0: i32, %arg1: i32) -> (i32, i32) {
    %c0_i32 = arith.constant 0 : i32
    %c0_i32_0 = arith.constant 0 : i32
    %c0_i32_1 = arith.constant 0 : i32
    return %c0_i32, %c0_i32_0 : i32, i32
  }
  func.func @transform_3(%arg0: i32, %arg1: i32) -> (i32, i32) {
    %c0_i32 = arith.constant 0 : i32
    %c0_i32_0 = arith.constant 0 : i32
    %c0_i32_1 = arith.constant 0 : i32
    return %c0_i32, %c0_i32_0 : i32, i32
  }
  func.func @transform_4(%arg0: i32, %arg1: i32) -> (i32, i32, i32) {
    %c0_i32 = arith.constant 0 : i32
    %c0_i32_0 = arith.constant 0 : i32
    return %arg0, %c0_i32, %arg1 : i32, i32, i32
  }
  func.func @transform_5(%arg0: i32, %arg1: i32) -> (i32, i32, i32) {
    %c0_i32 = arith.constant 0 : i32
    %c0_i32_0 = arith.constant 0 : i32
    return %arg0, %c0_i32, %arg1 : i32, i32, i32
  }
  func.func @transform_6(%arg0: i32, %arg1: i32) -> (i32, i32, i32) {
    %c0_i32 = arith.constant 0 : i32
    %c0_i32_0 = arith.constant 0 : i32
    return %arg0, %c0_i32, %arg1 : i32, i32, i32
  }
}

</mosaic_0001>

<bundles_post_ra>
// kernel: mel_loss.1
= control target key start
LH: loop header
LB: loop body
LE: loop exit
PB: predicated region body
PF: predicated region fallthrough
CT: control target
= control target key end

     0   :  { %s2665_s21 = smov 0   ;;  %s2667_s22 = smov 0   ;;  %s3157_s0 = inlined_call_operand.vmem [shape: bf16[2,128,128], index: 0, kind: input, shape index: {}]   ;;  %s3158_s1 = inlined_call_operand.vmem [shape: bf16[2,128,128], index: 1, kind: input, shape index: {}]   ;;  %s3159_s2 = inlined_call_operand.vmem [shape: bf16[128,256], index: 2, kind: input, shape index: {}]   ;;  %s3160_s3 = inlined_call_operand.vmem [shape: f32[128,128], index: 3, kind: input, shape index: {}]   ;;  %s3161_s4 = inlined_call_operand.vmem [shape: bf16[2,128,128], index: 4, kind: output, shape index: {0}]   ;;  %s3162_s5 = inlined_call_operand.vmem [shape: bf16[2,128,128], index: 5, kind: output, shape index: {1}]   ;;  %s3163_s6 = inlined_call_operand.vmem [shape: f32[2,1,128], index: 6, kind: output, shape index: {2}]  }
   0x1   :  { %s2669_s23 = smov 0  }
   0x2 LB: > { %s29_s24 = sadd.s32 1, %s2623_s22  ;;  %p2031_p0 = scmp.ge.s32.totalorder %s2627_s23, 1  ;;  %s2627_s23 = sphi %s2669_s23, %s17_s23   ;;  %s2623_s22 = sphi %s2667_s22, %s3165_s22   ;;  %s2619_s21 = sphi %s2665_s21, %s3164_s21  }
   0x3   : > { %p31_p1 = scmp.ge.s32.totalorder %s29_s24, 2  ;;  %p259_p2 = scmp.lt.s32.totalorder %s2627_s23, 3 }
   0x5   : > { %s3167_s24 = smov (%p31_p1, %s29_s24), 0  ;;  %p260_p3 = pnand %p2031_p0, %p259_p2 }
   0x6   : > { %p320_p4 = scmp.lt.s32.totalorder (!%p260_p3), %s2619_s21, 1 }
   0x7   : > { %263 = sbr.rel (%p260_p3) target bundleno = 968 (0x3c8), region = 36 }
   0xc   : > { %v2686_v0 = vld [vmem:[%s3159_s2 + $0x74] ss:$8 sps:$4 sm:$0xff]   ;;  %v2691_v1 = vld [vmem:[%s3159_s2 + $0x70] ss:$8 sps:$4 sm:$0xff]   ;;  %v2629_v2 = vmov 0   ;;  %s3169_s21 = smov (!%p320_p4, %s2619_s21), 1 }
   0xd   : > { %570 = vmatprep.mubr.bf16.mxu0 %v2629_v2  ;;  %538 = vmatprep.subr.bf16.mxu0 %v2686_v0  ;;  %v2698_v3 = vld [vmem:[%s3159_s2 + $0x64] ss:$8 sps:$4 sm:$0xff]   ;;  %v2706_v4 = vld [vmem:[%s3159_s2 + $0x60] ss:$8 sps:$4 sm:$0xff]   ;;  %v2712_v5 = vld [vmem:[%s3159_s2 + $0x54] ss:$8 sps:$4 sm:$0xff]   ;;  %s360_s27 = scalar_lea.vmem %s3163_s6, %s3169_s21 }
   0xe   : > { %539 = vmatpush1.bf16.msra.mxu0 %v2691_v1  ;;  %s2715_s11 = sshll.u32 %s3169_s21, 6  ;;  %v2721_v6 = vld [vmem:[%s3159_s2 + $0x50] ss:$8 sps:$4 sm:$0xff]   ;;  %v2727_v7 = vld [vmem:[%s3159_s2 + $0x44] ss:$8 sps:$4 sm:$0xff]  }
   0xf   : > { %540 = vmatprep.subr.bf16.mxu0 %v2698_v3  ;;  %s2733_s18 = scalar_lea.vmem %s3157_s0, %s2715_s11  ;;  %v2739_v8 = vld [vmem:[%s3159_s2 + $0x40] ss:$8 sps:$4 sm:$0xff]   ;;  %v2745_v9 = vld [vmem:[%s3159_s2 + $0x34] ss:$8 sps:$4 sm:$0xff]   ;;  %v2751_v10 = vld [vmem:[%s3159_s2 + $0x30] ss:$8 sps:$4 sm:$0xff]   ;;  %s2859_s14 = scalar_lea.vmem %s3158_s1, %s2715_s11 }
  0x10   : > { %v2757_v11 = vld [vmem:[%s3159_s2 + $0x24] ss:$8 sps:$4 sm:$0xff]   ;;  %v393_v12 = vld [vmem:[%s3160_s3 + $0x78] sm:$0xff]  ;;  %v2766_v13 = vld [vmem:[%s3159_s2 + $0x20] ss:$8 sps:$4 sm:$0xff]   ;;  %s3062_s17 = scalar_lea.vmem %s3161_s4, %s2715_s11  ;;  %s3118_s25 = scalar_lea.vmem %s3162_s5, %s2715_s11 }
  0x11   : > { %2300 = vmatprep.subr.mxu1 %v393_v12  ;;  %v2772_v14 = vld [vmem:[%s3159_s2 + $0x14] ss:$8 sps:$4 sm:$0xff]   ;;  %v2778_v15 = vld [vmem:[%s3159_s2 + $0x10] ss:$8 sps:$4 sm:$0xff]   ;;  %v2784_v16 = vld [vmem:[%s3159_s2 + $0x4] ss:$8 sps:$4 sm:$0xff]  }
  0x12   : > { %541 = vmatpush1.bf16.msra.mxu0 %v2706_v4  ;;  %2301 = vmatpush3.msra.mxu1 %v393_v12  ;;  %v2790_v17 = vld [vmem:[%s3159_s2] ss:$8 sps:$4 sm:$0xff]   ;;  %v2463_v20 = vld [vmem:[%s2733_s18 + $0x10] sm:$0xff]   ;;  %v2464_v21 = vld [vmem:[%s2733_s18 + $0x18] sm:$0xff]  }
  0x13   : > { %542 = vmatprep.subr.bf16.mxu0 %v2712_v5  ;;  %v2461_v18 = vld [vmem:[%s2733_s18] sm:$0xff]   ;;  %v2462_v19 = vld [vmem:[%s2733_s18 + $0x8] sm:$0xff]   ;;  %v2467_v24 = vld [vmem:[%s2733_s18 + $0x30] sm:$0xff]  }
  0x14   : > { %v2465_v22 = vld [vmem:[%s2733_s18 + $0x20] sm:$0xff]   ;;  %v2466_v23 = vld [vmem:[%s2733_s18 + $0x28] sm:$0xff]   ;;  %v2468_v25 = vld [vmem:[%s2733_s18 + $0x38] sm:$0xff]  }
  0x15   : > { %v392_v26 = vld [vmem:[%s3160_s3 + $0x70] sm:$0xff]  ;;  %v391_v27 = vld [vmem:[%s3160_s3 + $0x68] sm:$0xff]  ;;  %v390_v28 = vld [vmem:[%s3160_s3 + $0x60] sm:$0xff] }
  0x16   : > { %543 = vmatpush1.bf16.msra.mxu0 %v2721_v6  ;;  %2302 = vmatprep.subr.mxu1 %v392_v26  ;;  %v389_v29 = vld [vmem:[%s3160_s3 + $0x58] sm:$0xff]  ;;  %v388_v30 = vld [vmem:[%s3160_s3 + $0x50] sm:$0xff]  ;;  %v387_v31 = vld [vmem:[%s3160_s3 + $0x48] sm:$0xff] }
  0x17   : > { %544 = vmatprep.subr.bf16.mxu0 %v2727_v7  ;;  %2303 = vmatpush3.msra.mxu1 %v392_v26  ;;  %v386_v32 = vld [vmem:[%s3160_s3 + $0x40] sm:$0xff]  ;;  %v385_v33 = vld [vmem:[%s3160_s3 + $0x38] sm:$0xff]  ;;  %v384_v34 = vld [vmem:[%s3160_s3 + $0x30] sm:$0xff] }
  0x18   : > { %2304 = vmatprep.subr.mxu1 %v391_v27  ;;  %v383_v35 = vld [vmem:[%s3160_s3 + $0x28] sm:$0xff]  ;;  %v382_v36 = vld [vmem:[%s3160_s3 + $0x20] sm:$0xff]  ;;  %v381_v37 = vld [vmem:[%s3160_s3 + $0x18] sm:$0xff] }
  0x19   : > { %2305 = vmatpush3.msra.mxu1 %v391_v27  ;;  %v380_v38 = vld [vmem:[%s3160_s3 + $0x10] sm:$0xff]  ;;  %v379_v39 = vld [vmem:[%s3160_s3 + $0x8] sm:$0xff]  ;;  %v378_v40 = vld [vmem:[%s3160_s3] sm:$0xff] }
  0x1a   : > { %545 = vmatpush1.bf16.msra.mxu0 %v2739_v8  ;;  %2306 = vmatprep.subr.mxu1 %v390_v28 }
  0x1b   : > { %546 = vmatprep.subr.bf16.mxu0 %v2745_v9  ;;  %2307 = vmatpush3.msra.mxu1 %v390_v28 }
  0x1c   : > { %2308 = vmatprep.subr.mxu1 %v389_v29 }
  0x1d   : > { %2309 = vmatpush3.msra.mxu1 %v389_v29 }
  0x1e   : > { %547 = vmatpush1.bf16.msra.mxu0 %v2751_v10  ;;  %2310 = vmatprep.subr.mxu1 %v388_v30 }
  0x1f   : > { %548 = vmatprep.subr.bf16.mxu0 %v2757_v11  ;;  %2311 = vmatpush3.msra.mxu1 %v388_v30 }
  0x20   : > { %2312 = vmatprep.subr.mxu1 %v387_v31 }
  0x21   : > { %2313 = vmatpush3.msra.mxu1 %v387_v31 }
  0x22   : > { %549 = vmatpush1.bf16.msra.mxu0 %v2766_v13  ;;  %2314 = vmatprep.subr.mxu1 %v386_v32 }
  0x23   : > { %550 = vmatprep.subr.bf16.mxu0 %v2772_v14  ;;  %2315 = vmatpush3.msra.mxu1 %v386_v32 }
  0x24   : > { %2316 = vmatprep.subr.mxu1 %v385_v33 }
  0x25   : > { %2317 = vmatpush3.msra.mxu1 %v385_v33 }
  0x26   : > { %551 = vmatpush1.bf16.msra.mxu0 %v2778_v15  ;;  %2318 = vmatprep.subr.mxu1 %v384_v34 }
  0x27   : > { %552 = vmatprep.subr.bf16.mxu0 %v2784_v16  ;;  %2319 = vmatpush3.msra.mxu1 %v384_v34 }
  0x28   : > { %2320 = vmatprep.subr.mxu1 %v383_v35 }
  0x29   : > { %2321 = vmatpush3.msra.mxu1 %v383_v35 }
  0x2a   : > { %553 = vmatpush1.bf16.msra.mxu0 %v2790_v17  ;;  %2322 = vmatprep.subr.mxu1 %v382_v36 }
  0x2b   : > { %2356 = vmatprep.subr.mxu0 %v393_v12  ;;  %2323 = vmatpush3.msra.mxu1 %v382_v36 }
  0x2c   : > { %2324 = vmatprep.subr.mxu1 %v381_v37 }
  0x2d   : > { %571 = vmatmul.mubr.bf16.vlgmr.msra.gmra.mxu0 %v2461_v18  ;;  %2325 = vmatpush3.msra.mxu1 %v381_v37 }
  0x2e   : > { %580 = vmatprep.mubr.bf16.mxu0 %v2629_v2  ;;  %2357 = vmatpush3.msra.mxu0 %v393_v12 }
  0x2f   : > { %2358 = vmatprep.subr.mxu0 %v392_v26  ;;  %2326 = vmatprep.subr.mxu1 %v380_v38 }
  0x30   : > { %2359 = vmatpush3.msra.mxu0 %v392_v26  ;;  %2327 = vmatpush3.msra.mxu1 %v380_v38 }
  0x31   : > { %2360 = vmatprep.subr.mxu0 %v391_v27  ;;  %2328 = vmatprep.subr.mxu1 %v379_v39 }
  0x32   : > { %2361 = vmatpush3.msra.mxu0 %v391_v27  ;;  %2329 = vmatpush3.msra.mxu1 %v379_v39 }
  0x33   : > { %2362 = vmatprep.subr.mxu0 %v390_v28  ;;  %2330 = vmatprep.subr.mxu1 %v378_v40 }
  0x34   : > { %2363 = vmatpush3.msra.mxu0 %v390_v28  ;;  %2331 = vmatpush3.msra.mxu1 %v378_v40 }
  0x35   : > { %581 = vmatmul.mubr.bf16.gmra.mxu0 %v2462_v19  ;;  %2364 = vmatprep.subr.mxu0 %v389_v29 }
  0x36   : > { %590 = vmatprep.mubr.bf16.mxu0 %v2629_v2  ;;  %2365 = vmatpush3.msra.mxu0 %v389_v29 }
  0x37   : > { %2366 = vmatprep.subr.mxu0 %v388_v30  ;;  %1116 = vmatprep.subr.bf16.mxu1 %v2686_v0 }
  0x38   : > { %2367 = vmatpush3.msra.mxu0 %v388_v30 }
  0x39   : > { %2368 = vmatprep.subr.mxu0 %v387_v31 }
  0x3a   : > { %2369 = vmatpush3.msra.mxu0 %v387_v31 }
  0x3b   : > { %2370 = vmatprep.subr.mxu0 %v386_v32 }
  0x3c   : > { %2371 = vmatpush3.msra.mxu0 %v386_v32 }
  0x3d   : > { %591 = vmatmul.mubr.bf16.gmra.mxu0 %v2463_v20  ;;  %2372 = vmatprep.subr.mxu0 %v385_v33 }
  0x3e   : > { %600 = vmatprep.mubr.bf16.mxu0 %v2629_v2  ;;  %2373 = vmatpush3.msra.mxu0 %v385_v33 }
  0x3f   : > { %2374 = vmatprep.subr.mxu0 %v384_v34 }
  0x40   : > { %2375 = vmatpush3.msra.mxu0 %v384_v34 }
  0x41   : > { %2376 = vmatprep.subr.mxu0 %v383_v35 }
  0x42   : > { %2377 = vmatpush3.msra.mxu0 %v383_v35 }
  0x43   : > { %2378 = vmatprep.subr.mxu0 %v382_v36 }
  0x44   : > { %2379 = vmatpush3.msra.mxu0 %v382_v36 }
  0x45   : > { %601 = vmatmul.mubr.bf16.gmra.mxu0 %v2464_v21  ;;  %2380 = vmatprep.subr.mxu0 %v381_v37 }
  0x46   : > { %610 = vmatprep.mubr.bf16.mxu0 %v2629_v2  ;;  %2381 = vmatpush3.msra.mxu0 %v381_v37 }
  0x47   : > { %2382 = vmatprep.subr.mxu0 %v380_v38 }
  0x48   : > { %2383 = vmatpush3.msra.mxu0 %v380_v38 }
  0x49   : > { %2384 = vmatprep.subr.mxu0 %v379_v39 }
  0x4a   : > { %2385 = vmatpush3.msra.mxu0 %v379_v39 }
  0x4b   : > { %2386 = vmatprep.subr.mxu0 %v378_v40 }
  0x4c   : > { %2387 = vmatpush3.msra.mxu0 %v378_v40 }
  0x4d   : > { %611 = vmatmul.mubr.bf16.gmra.mxu0 %v2465_v22 }
  0x4e   : > { %620 = vmatprep.mubr.bf16.mxu0 %v2629_v2 }
  0x55   : > { %621 = vmatmul.mubr.bf16.gmra.mxu0 %v2466_v23 }
  0x56   : > { %630 = vmatprep.mubr.bf16.mxu0 %v2629_v2 }
  0x5d   : > { %631 = vmatmul.mubr.bf16.gmra.mxu0 %v2467_v24 }
  0x5e   : > { %640 = vmatprep.mubr.bf16.mxu0 %v2629_v2 }
  0x65   : > { %641 = vmatmul.mubr.bf16.gmra.mxu0 %v2468_v25 }
  0xed   : > { %v572_v41 = vpop.f32.mrf.mxu0 }
  0xee   : > { %v651_v43 = vmul.f32 %v572_v41, %v572_v41 }
  0xef   : > { %v574_v42 = vpop.f32.mrf.mxu0 }
  0xf0   : > { %v667_v44 = vmul.f32 %v574_v42, %v574_v42 }
  0xf1   : > { %v576_v45 = vpop.f32.mrf.mxu0 }
  0xf2   : > { %v683_v46 = vadd.f32 %v667_v44, %v651_v43  ;;  %v652_v49 = vmul.f32 %v576_v45, %v576_v45 }
  0xf3   : > { %v578_v47 = vpop.f32.mrf.mxu0 }
  0xf4   : > { %v699_v48 = vadd.f32 1e-24, %v683_v46  ;;  %v668_v50 = vmul.f32 %v578_v47, %v578_v47 }
  0xf5   : > { %v582_v51 = vpop.f32.mrf.mxu0 }
  0xf6   : > { %v684_v52 = vadd.f32 %v668_v50, %v652_v49  ;;  %2477 = vrsqrt.f32 %v699_v48  ;;  %v653_v55 = vmul.f32 %v582_v51, %v582_v51  ;;  %vm717_vm0 = vcmp.eq.f32.partialorder %v699_v48, inf }
  0xf7   : > { %v584_v53 = vpop.f32.mrf.mxu0  ;;  %v720_v30 = vand.u32 2147483648, %v699_v48  ;;  %vm719_vm1 = vcmp.eq.f32.partialorder %v699_v48, 0.0 }
  0xf8   : > { %v700_v54 = vadd.f32 1e-24, %v684_v52  ;;  %v669_v56 = vmul.f32 %v584_v53, %v584_v53 }
  0xf9   : > { %v586_v57 = vpop.f32.mrf.mxu0 }
  0xfa   : > { %2479 = vrsqrt.f32 %v700_v54  ;;  %v685_v58 = vadd.f32 %v669_v56, %v653_v55  ;;  %v654_v61 = vmul.f32 %v586_v57, %v586_v57  ;;  %vm724_vm2 = vcmp.eq.f32.partialorder %v700_v54, inf }
  0xfb   : > { %v588_v59 = vpop.f32.mrf.mxu0  ;;  %v727_v41 = vand.u32 2147483648, %v700_v54  ;;  %vm726_vm3 = vcmp.eq.f32.partialorder %v700_v54, 0.0 }
  0xfc   : > { %v701_v60 = vadd.f32 1e-24, %v685_v58  ;;  %v670_v62 = vmul.f32 %v588_v59, %v588_v59 }
  0xfd   : > { %v592_v63 = vpop.f32.mrf.mxu0 }
  0xfe   : > { %2481 = vrsqrt.f32 %v701_v60  ;;  %v686_v0 = vadd.f32 %v670_v62, %v654_v61  ;;  %v655_v19 = vmul.f32 %v592_v63, %v592_v63  ;;  %vm731_vm4 = vcmp.eq.f32.partialorder %v701_v60, inf }
  0xff   : > { %v594_v12 = vpop.f32.mrf.mxu0  ;;  %v734_v52 = vand.u32 2147483648, %v701_v60  ;;  %vm733_vm5 = vcmp.eq.f32.partialorder %v701_v60, 0.0 }
 0x100   : > { %v2861_v18 = vadd.f32 1e-24, %v686_v0  ;;  %v671_v20 = vmul.f32 %v594_v12, %v594_v12 }
 0x101   : > { %v596_v21 = vpop.f32.mrf.mxu0 }
 0x102   : > { %2483 = vrsqrt.f32 %v2861_v18  ;;  %v687_v22 = vadd.f32 %v671_v20, %v655_v19  ;;  %v656_v26 = vmul.f32 %v596_v21, %v596_v21  ;;  %vm738_vm6 = vcmp.eq.f32.partialorder %v2861_v18, inf }
 0x103   : > { %v2478_v23 = vpop.eup %2477  ;;  %v598_v24 = vpop.f32.mrf.mxu0  ;;  %vm740_vm7 = vcmp.eq.f32.partialorder %v2861_v18, 0.0 }
 0x104   : > { %v2864_v25 = vadd.f32 1e-24, %v687_v22  ;;  %v672_v27 = vmul.f32 %v598_v24, %v598_v24  ;;  %v716_v28 = vmul.f32 %v2478_v23, %v699_v48 }
 0x105   : > { %v602_v29 = vpop.f32.mrf.mxu0 }
 0x106   : > { %2485 = vrsqrt.f32 %v2864_v25  ;;  %v688_v31 = vadd.f32 %v672_v27, %v656_v26  ;;  %v718_v32 = vsel %vm717_vm0, %v699_v48, %v716_v28  ;;  %v657_v37 = vmul.f32 %v602_v29, %v602_v29 }
 0x107   : > { %v2480_v33 = vpop.eup %2479  ;;  %v604_v34 = vpop.f32.mrf.mxu0  ;;  %v721_v35 = vsel %vm719_vm1, %v720_v30, %v718_v32  ;;  %vm745_vm8 = vcmp.eq.f32.partialorder %v2864_v25, inf  ;;  %v748_v24 = vand.u32 2147483648, %v2864_v25  ;;  %vm747_vm9 = vcmp.eq.f32.partialorder %v2864_v25, 0.0 }
 0x108   : > { %v2867_v36 = vadd.f32 1e-24, %v688_v31  ;;  %v673_v38 = vmul.f32 %v604_v34, %v604_v34  ;;  %2332 = vmatprep.mubr.f32.mxu1 %v721_v35  ;;  %v723_v39 = vmul.f32 %v2480_v33, %v700_v54 }
 0x109   : > { %v606_v40 = vpop.f32.mrf.mxu0 }
 0x10a   : > { %2487 = vrsqrt.f32 %v2867_v36  ;;  %v689_v42 = vadd.f32 %v673_v38, %v657_v37  ;;  %v725_v43 = vsel %vm724_vm2, %v700_v54, %v723_v39  ;;  %v658_v48 = vmul.f32 %v606_v40, %v606_v40 }
 0x10b   : > { %v2482_v44 = vpop.eup %2481  ;;  %v608_v45 = vpop.f32.mrf.mxu0  ;;  %v728_v46 = vsel %vm726_vm3, %v727_v41, %v725_v43  ;;  %vm752_vm10 = vcmp.eq.f32.partialorder %v2867_v36, inf  ;;  %v755_v33 = vand.u32 2147483648, %v2867_v36  ;;  %vm754_vm11 = vcmp.eq.f32.partialorder %v2867_v36, 0.0 }
 0x10c   : > { %v2870_v47 = vadd.f32 1e-24, %v689_v42  ;;  %v674_v49 = vmul.f32 %v608_v45, %v608_v45  ;;  %2333 = vmatmul.mubr.f32.vlgmr.msra.gmra.mxu1 %v728_v46  ;;  %v730_v50 = vmul.f32 %v2482_v44, %v701_v60 }
 0x10d   : > { %v612_v51 = vpop.f32.mrf.mxu0  ;;  %1117 = vmatpush1.bf16.msra.mxu1 %v2691_v1  ;;  %v741_v1 = vand.u32 2147483648, %v2861_v18 }
 0x10e   : > { %2489 = vrsqrt.f32 %v2870_v47  ;;  %v690_v53 = vadd.f32 %v674_v49, %v658_v48  ;;  %v732_v55 = vsel %vm731_vm4, %v701_v60, %v730_v50  ;;  %1118 = vmatprep.subr.bf16.mxu1 %v2698_v3  ;;  %v659_v59 = vmul.f32 %v612_v51, %v612_v51 }
 0x10f   : > { %v2484_v54 = vpop.eup %2483  ;;  %v614_v56 = vpop.f32.mrf.mxu0  ;;  %v735_v57 = vsel %vm733_vm5, %v734_v52, %v732_v55  ;;  %vm759_vm12 = vcmp.eq.f32.partialorder %v2870_v47, inf  ;;  %v762_v42 = vand.u32 2147483648, %v2870_v47  ;;  %vm761_vm13 = vcmp.eq.f32.partialorder %v2870_v47, 0.0 }
 0x110   : > { %v2875_v58 = vadd.f32 1e-24, %v690_v53  ;;  %v675_v61 = vmul.f32 %v614_v56, %v614_v56  ;;  %2335 = vmatprep.mubr.f32.mxu1 %v735_v57  ;;  %v737_v62 = vmul.f32 %v2484_v54, %v2861_v18 }
 0x111   : > { %v616_v63 = vpop.f32.mrf.mxu0  ;;  %1119 = vmatpush1.bf16.msra.mxu1 %v2706_v4 }
 0x112   : > { %2491 = vrsqrt.f32 %v2875_v58  ;;  %v691_v3 = vadd.f32 %v675_v61, %v659_v59  ;;  %v739_v60 = vsel %vm738_vm6, %v2861_v18, %v737_v62  ;;  %1120 = vmatprep.subr.bf16.mxu1 %v2712_v5  ;;  %v660_v21 = vmul.f32 %v616_v63, %v616_v63 }
 0x113   : > { %v2486_v0 = vpop.eup %2485  ;;  %v618_v12 = vpop.f32.mrf.mxu0  ;;  %v742_v19 = vsel %vm740_vm7, %v741_v1, %v739_v60  ;;  %vm766_vm14 = vcmp.eq.f32.partialorder %v2875_v58, inf  ;;  %v769_v51 = vand.u32 2147483648, %v2875_v58  ;;  %vm768_vm15 = vcmp.eq.f32.partialorder %v2875_v58, 0.0 }
 0x114   : > { %v2885_v20 = vadd.f32 1e-24, %v691_v3  ;;  %v676_v22 = vmul.f32 %v618_v12, %v618_v12  ;;  %2336 = vmatmul.mubr.f32.gmra.mxu1 %v742_v19  ;;  %v744_v23 = vmul.f32 %v2486_v0, %v2864_v25 }
 0x115   : > { %v622_v4 = vpop.f32.mrf.mxu0  ;;  %1121 = vmatpush1.bf16.msra.mxu1 %v2721_v6 }
 0x116   : > { %2493 = vrsqrt.f32 %v2885_v20  ;;  %v692_v5 = vadd.f32 %v676_v22, %v660_v21  ;;  %v746_v18 = vsel %vm745_vm8, %v2864_v25, %v744_v23  ;;  %1122 = vmatprep.subr.bf16.mxu1 %v2727_v7  ;;  %v661_v30 = vmul.f32 %v622_v4, %v622_v4 }
 0x117   : > { %v2488_v26 = vpop.eup %2487  ;;  %v624_v27 = vpop.f32.mrf.mxu0  ;;  %v749_v28 = vsel %vm747_vm9, %v748_v24, %v746_v18  ;;  %vm773_vm0 = vcmp.eq.f32.partialorder %v2885_v20, inf  ;;  %v776_v61 = vand.u32 2147483648, %v2885_v20  ;;  %vm775_vm1 = vcmp.eq.f32.partialorder %v2885_v20, 0.0 }
 0x118   : > { %v2895_v29 = vadd.f32 1e-24, %v692_v5  ;;  %v677_v31 = vmul.f32 %v624_v27, %v624_v27  ;;  %2338 = vmatprep.mubr.f32.mxu1 %v749_v28  ;;  %v751_v32 = vmul.f32 %v2488_v26, %v2867_v36 }
 0x119   : > { %v626_v6 = vpop.f32.mrf.mxu0  ;;  %1123 = vmatpush1.bf16.msra.mxu1 %v2739_v8 }
 0x11a   : > { %2495 = vrsqrt.f32 %v2895_v29  ;;  %v693_v7 = vadd.f32 %v677_v31, %v661_v30  ;;  %v753_v25 = vsel %vm752_vm10, %v2867_v36, %v751_v32  ;;  %1124 = vmatprep.subr.bf16.mxu1 %v2745_v9  ;;  %v662_v39 = vmul.f32 %v626_v6, %v626_v6 }
 0x11b   : > { %v2490_v34 = vpop.eup %2489  ;;  %v628_v35 = vpop.f32.mrf.mxu0  ;;  %v756_v37 = vsel %vm754_vm11, %v755_v33, %v753_v25  ;;  %vm780_vm2 = vcmp.eq.f32.partialorder %v2895_v29, inf  ;;  %vm782_vm3 = vcmp.eq.f32.partialorder %v2895_v29, 0.0 }
 0x11c   : > { %v2905_v38 = vadd.f32 1e-24, %v693_v7  ;;  %v678_v40 = vmul.f32 %v628_v35, %v628_v35  ;;  %2339 = vmatmul.mubr.f32.gmra.mxu1 %v756_v37  ;;  %v758_v41 = vmul.f32 %v2490_v34, %v2870_v47 }
 0x11d   : > { %v632_v8 = vpop.f32.mrf.mxu0  ;;  %1125 = vmatpush1.bf16.msra.mxu1 %v2751_v10 }
 0x11e   : > { %2497 = vrsqrt.f32 %v2905_v38  ;;  %v694_v9 = vadd.f32 %v678_v40, %v662_v39  ;;  %v760_v36 = vsel %vm759_vm12, %v2870_v47, %v758_v41  ;;  %1126 = vmatprep.subr.bf16.mxu1 %v2757_v11  ;;  %v663_v48 = vmul.f32 %v632_v8, %v632_v8 }
 0x11f   : > { %v2492_v43 = vpop.eup %2491  ;;  %v634_v44 = vpop.f32.mrf.mxu0  ;;  %v763_v45 = vsel %vm761_vm13, %v762_v42, %v760_v36  ;;  %vm787_vm4 = vcmp.eq.f32.partialorder %v2905_v38, inf  ;;  %v790_v26 = vand.u32 2147483648, %v2905_v38  ;;  %vm789_vm5 = vcmp.eq.f32.partialorder %v2905_v38, 0.0 }
 0x120   : > { %v2915_v46 = vadd.f32 1e-24, %v694_v9  ;;  %v679_v49 = vmul.f32 %v634_v44, %v634_v44  ;;  %2341 = vmatprep.mubr.f32.mxu1 %v763_v45  ;;  %v765_v50 = vmul.f32 %v2492_v43, %v2875_v58 }
 0x121   : > { %v636_v10 = vpop.f32.mrf.mxu0  ;;  %1127 = vmatpush1.bf16.msra.mxu1 %v2766_v13 }
 0x122   : > { %2499 = vrsqrt.f32 %v2915_v46  ;;  %v695_v11 = vadd.f32 %v679_v49, %v663_v48  ;;  %v767_v47 = vsel %vm766_vm14, %v2875_v58, %v765_v50  ;;  %1128 = vmatprep.subr.bf16.mxu1 %v2772_v14  ;;  %v664_v56 = vmul.f32 %v636_v10, %v636_v10  ;;  %v2469_v10 = vld [vmem:[%s2859_s14] sm:$0xff]  }
 0x123   : > { %v2494_v52 = vpop.eup %2493  ;;  %v638_v53 = vpop.f32.mrf.mxu0  ;;  %v770_v55 = vsel %vm768_vm15, %v769_v51, %v767_v47  ;;  %vm794_vm6 = vcmp.eq.f32.partialorder %v2915_v46, inf  ;;  %v797_v32 = vand.u32 2147483648, %v2915_v46  ;;  %vm796_vm7 = vcmp.eq.f32.partialorder %v2915_v46, 0.0  ;;  %v2470_v51 = vld [vmem:[%s2859_s14 + $0x8] sm:$0xff]   ;;  %v2472_v47 = vld [vmem:[%s2859_s14 + $0x18] sm:$0xff]  }
 0x124   : > { %v2925_v54 = vadd.f32 1e-24, %v695_v11  ;;  %v680_v57 = vmul.f32 %v638_v53, %v638_v53  ;;  %2342 = vmatmul.mubr.f32.gmra.mxu1 %v770_v55  ;;  %v772_v59 = vmul.f32 %v2494_v52, %v2885_v20  ;;  %v2471_v11 = vld [vmem:[%s2859_s14 + $0x10] sm:$0xff]   ;;  %v2473_v52 = vld [vmem:[%s2859_s14 + $0x20] sm:$0xff]   ;;  %v2474_v53 = vld [vmem:[%s2859_s14 + $0x28] sm:$0xff]  }
 0x125   : > { %v642_v13 = vpop.f32.mrf.mxu0  ;;  %1129 = vmatpush1.bf16.msra.mxu1 %v2778_v15  ;;  %v783_v15 = vand.u32 2147483648, %v2895_v29  ;;  %v2475_v55 = vld [vmem:[%s2859_s14 + $0x30] sm:$0xff]  }
 0x126   : > { %2501 = vrsqrt.f32 %v2925_v54  ;;  %v696_v14 = vadd.f32 %v680_v57, %v664_v56  ;;  %v774_v58 = vsel %vm773_vm0, %v2885_v20, %v772_v59  ;;  %1130 = vmatprep.subr.bf16.mxu1 %v2784_v16  ;;  %v665_v60 = vmul.f32 %v642_v13, %v642_v13 }
 0x127   : > { %v2496_v62 = vpop.eup %2495  ;;  %v644_v63 = vpop.f32.mrf.mxu0  ;;  %v777_v1 = vsel %vm775_vm1, %v776_v61, %v774_v58  ;;  %vm801_vm8 = vcmp.eq.f32.partialorder %v2925_v54, inf  ;;  %v804_v34 = vand.u32 2147483648, %v2925_v54  ;;  %vm803_vm9 = vcmp.eq.f32.partialorder %v2925_v54, 0.0 }
 0x128   : > { %v712_v3 = vadd.f32 1e-24, %v696_v14  ;;  %v681_v0 = vmul.f32 %v644_v63, %v644_v63  ;;  %2344 = vmatprep.mubr.f32.mxu1 %v777_v1  ;;  %v779_v12 = vmul.f32 %v2496_v62, %v2895_v29 }
 0x129   : > { %v646_v19 = vpop.f32.mrf.mxu0  ;;  %1131 = vmatpush1.bf16.msra.mxu1 %v2790_v17 }
 0x12a   : > { %2503 = vrsqrt.f32 %v712_v3  ;;  %v697_v20 = vadd.f32 %v681_v0, %v665_v60  ;;  %v781_v16 = vsel %vm780_vm2, %v2895_v29, %v779_v12  ;;  %v666_v24 = vmul.f32 %v646_v19, %v646_v19 }
 0x12b   : > { %v2498_v21 = vpop.eup %2497  ;;  %v648_v22 = vpop.f32.mrf.mxu0  ;;  %v784_v23 = vsel %vm782_vm3, %v783_v15, %v781_v16  ;;  %vm808_vm10 = vcmp.eq.f32.partialorder %v712_v3, inf  ;;  %v811_v40 = vand.u32 2147483648, %v712_v3  ;;  %vm810_vm11 = vcmp.eq.f32.partialorder %v712_v3, 0.0 }
 0x12c   : > { %v713_v4 = vadd.f32 1e-24, %v697_v20  ;;  %v682_v5 = vmul.f32 %v648_v22, %v648_v22  ;;  %2345 = vmatmul.mubr.f32.gmra.mxu1 %v784_v23  ;;  %v786_v18 = vmul.f32 %v2498_v21, %v2905_v38 }
 0x12e   : > { %2505 = vrsqrt.f32 %v713_v4  ;;  %v698_v17 = vadd.f32 %v682_v5, %v666_v24  ;;  %v788_v27 = vsel %vm787_vm4, %v2905_v38, %v786_v18  ;;  %vm815_vm12 = vcmp.eq.f32.partialorder %v713_v4, inf }
 0x12f   : > { %v2500_v28 = vpop.eup %2499  ;;  %v791_v29 = vsel %vm789_vm5, %v790_v26, %v788_v27  ;;  %v818_v36 = vand.u32 2147483648, %v713_v4  ;;  %vm817_vm13 = vcmp.eq.f32.partialorder %v713_v4, 0.0 }
 0x130   : > { %v714_v30 = vadd.f32 1e-24, %v698_v17  ;;  %2347 = vmatprep.mubr.f32.mxu1 %v791_v29  ;;  %v793_v31 = vmul.f32 %v2500_v28, %v2915_v46 }
 0x132   : > { %2507 = vrsqrt.f32 %v714_v30  ;;  %v795_v6 = vsel %vm794_vm6, %v2915_v46, %v793_v31  ;;  %vm822_vm14 = vcmp.eq.f32.partialorder %v714_v30, inf  ;;  %v825_v48 = vand.u32 2147483648, %v714_v30 }
 0x133   : > { %v2502_v33 = vpop.eup %2501  ;;  %v798_v7 = vsel %vm796_vm7, %v797_v32, %v795_v6  ;;  %vm824_vm15 = vcmp.eq.f32.partialorder %v714_v30, 0.0 }
 0x134   : > { %2348 = vmatmul.mubr.f32.gmra.mxu1 %v798_v7  ;;  %v800_v25 = vmul.f32 %v2502_v33, %v2925_v54 }
 0x136   : > { %v802_v35 = vsel %vm801_vm8, %v2925_v54, %v800_v25  ;;  %v2476_v54 = vld [vmem:[%s2859_s14 + $0x38] sm:$0xff]  }
 0x137   : > { %v2504_v37 = vpop.eup %2503  ;;  %v805_v38 = vsel %vm803_vm9, %v804_v34, %v802_v35 }
 0x138   : > { %2350 = vmatprep.mubr.f32.mxu1 %v805_v38  ;;  %v807_v39 = vmul.f32 %v2504_v37, %v712_v3 }
 0x13a   : > { %v809_v41 = vsel %vm808_vm10, %v712_v3, %v807_v39 }
 0x13b   : > { %v2506_v8 = vpop.eup %2505  ;;  %v812_v42 = vsel %vm810_vm11, %v811_v40, %v809_v41 }
 0x13c   : > { %2351 = vmatmul.mubr.f32.gmra.mxu1 %v812_v42  ;;  %v814_v9 = vmul.f32 %v2506_v8, %v713_v4 }
 0x13e   : > { %v816_v43 = vsel %vm815_vm12, %v713_v4, %v814_v9 }
 0x13f   : > { %v2508_v44 = vpop.eup %2507  ;;  %v819_v45 = vsel %vm817_vm13, %v818_v36, %v816_v43 }
 0x140   : > { %2353 = vmatprep.mubr.f32.mxu1 %v819_v45  ;;  %v821_v46 = vmul.f32 %v2508_v44, %v714_v30 }
 0x142   : > { %v823_v49 = vsel %vm822_vm14, %v714_v30, %v821_v46 }
 0x143   : > { %v826_v50 = vsel %vm824_vm15, %v825_v48, %v823_v49 }
 0x144   : > { %2354 = vmatmul.mubr.f32.gmra.mxu1 %v826_v50 }
 0x145   : > { %1148 = vmatprep.mubr.bf16.mxu1 %v2629_v2 }
 0x148   : > { %1149 = vmatmul.mubr.bf16.vlgmr.msra.gmra.mxu1 %v2469_v10 }
 0x149   : > { %1158 = vmatprep.mubr.bf16.mxu1 %v2629_v2 }
 0x150   : > { %1159 = vmatmul.mubr.bf16.gmra.mxu1 %v2470_v51 }
 0x151   : > { %1168 = vmatprep.mubr.bf16.mxu1 %v2629_v2 }
 0x158   : > { %1169 = vmatmul.mubr.bf16.gmra.mxu1 %v2471_v11 }
 0x159   : > { %1178 = vmatprep.mubr.bf16.mxu1 %v2629_v2 }
 0x160   : > { %1179 = vmatmul.mubr.bf16.gmra.mxu1 %v2472_v47 }
 0x161   : > { %1188 = vmatprep.mubr.bf16.mxu1 %v2629_v2 }
 0x168   : > { %1189 = vmatmul.mubr.bf16.gmra.mxu1 %v2473_v52 }
 0x169   : > { %1198 = vmatprep.mubr.bf16.mxu1 %v2629_v2 }
 0x170   : > { %1199 = vmatmul.mubr.bf16.gmra.mxu1 %v2474_v53 }
 0x171   : > { %1208 = vmatprep.mubr.bf16.mxu1 %v2629_v2 }
 0x178   : > { %1209 = vmatmul.mubr.bf16.gmra.mxu1 %v2475_v55 }
 0x179   : > { %1218 = vmatprep.mubr.bf16.mxu1 %v2629_v2 }
 0x180   : > { %1219 = vmatmul.mubr.bf16.gmra.mxu1 %v2476_v54 }
 0x1cc   : > { %v2334_v56 = vpop.f32.mrf.mxu1 }
 0x1cd   : > { %v973_v59 = vmax.f32 %v2334_v56, 1e-05 }
 0x1ce   : > { %v893_v57 = vpop.f32.mrf.mxu1 }
 0x1cf   : > { %v972_v13 = vmax.f32 %v893_v57, 1e-05 }
 0x1d1   : > { %2509 = vlog2.f32 %v972_v13 }
 0x1d2   : > { %2511 = vlog2.f32 %v973_v59 }
 0x1d4   : > { %v2337_v61 = vpop.f32.mrf.mxu1 }
 0x1d5   : > { %v975_v58 = vmax.f32 %v2337_v61, 1e-05 }
 0x1d6   : > { %v903_v14 = vpop.f32.mrf.mxu1 }
 0x1d7   : > { %v974_v62 = vmax.f32 %v903_v14, 1e-05 }
 0x1d9   : > { %2513 = vlog2.f32 %v974_v62 }
 0x1da   : > { %2515 = vlog2.f32 %v975_v58 }
 0x1dc   : > { %v2340_v63 = vpop.f32.mrf.mxu1 }
 0x1dd   : > { %v977_v60 = vmax.f32 %v2340_v63, 1e-05 }
 0x1de   : > { %v2510_v1 = vpop.eup %2509  ;;  %v913_v3 = vpop.f32.mrf.mxu1 }
 0x1df   : > { %v976_v0 = vmax.f32 %v913_v3, 1e-05  ;;  %v989_v2 = vmul.f32 0.6931472, %v2510_v1  ;;  %v2512_v12 = vpop.eup %2511 }
 0x1e0   : > { %v991_v19 = vmul.f32 0.6931472, %v2512_v12 }
 0x1e1   : > { %2517 = vlog2.f32 %v976_v0  ;;  %1020 = vxpose.xlu0.b32.start [1/16] %v989_v2, 128 }
 0x1e2   : > { %2519 = vlog2.f32 %v977_v60 }
 0x1e4   : > { %v2343_v15 = vpop.f32.mrf.mxu1 }
 0x1e5   : > { %1021 = vxpose.xlu0.b32.cont [2/16] %v991_v19, 128  ;;  %v979_v21 = vmax.f32 %v2343_v15, 1e-05 }
 0x1e6   : > { %v2514_v20 = vpop.eup %2513  ;;  %v923_v16 = vpop.f32.mrf.mxu1 }
 0x1e7   : > { %v978_v22 = vmax.f32 %v923_v16, 1e-05  ;;  %v993_v23 = vmul.f32 0.6931472, %v2514_v20  ;;  %v2516_v4 = vpop.eup %2515 }
 0x1e8   : > { %v995_v24 = vmul.f32 0.6931472, %v2516_v4 }
 0x1e9   : > { %2521 = vlog2.f32 %v978_v22  ;;  %1022 = vxpose.xlu0.b32.cont [3/16] %v993_v23, 128 }
 0x1ea   : > { %2523 = vlog2.f32 %v979_v21 }
 0x1ec   : > { %v2346_v5 = vpop.f32.mrf.mxu1 }
 0x1ed   : > { %1023 = vxpose.xlu0.b32.cont [4/16] %v995_v24, 128  ;;  %v981_v17 = vmax.f32 %v2346_v5, 1e-05 }
 0x1ee   : > { %v2518_v18 = vpop.eup %2517  ;;  %v933_v26 = vpop.f32.mrf.mxu1 }
 0x1ef   : > { %v980_v27 = vmax.f32 %v933_v26, 1e-05  ;;  %v997_v28 = vmul.f32 0.6931472, %v2518_v18  ;;  %v2520_v29 = vpop.eup %2519 }
 0x1f0   : > { %v999_v30 = vmul.f32 0.6931472, %v2520_v29 }
 0x1f1   : > { %2525 = vlog2.f32 %v980_v27  ;;  %1024 = vxpose.xlu0.b32.cont [5/16] %v997_v28, 128 }
 0x1f2   : > { %2527 = vlog2.f32 %v981_v17 }
 0x1f4   : > { %v2349_v31 = vpop.f32.mrf.mxu1 }
 0x1f5   : > { %1025 = vxpose.xlu0.b32.cont [6/16] %v999_v30, 128  ;;  %v983_v33 = vmax.f32 %v2349_v31, 1e-05 }
 0x1f6   : > { %v2522_v32 = vpop.eup %2521  ;;  %v943_v6 = vpop.f32.mrf.mxu1 }
 0x1f7   : > { %v982_v7 = vmax.f32 %v943_v6, 1e-05  ;;  %v1001_v25 = vmul.f32 0.6931472, %v2522_v32  ;;  %v2524_v34 = vpop.eup %2523 }
 0x1f8   : > { %v1003_v35 = vmul.f32 0.6931472, %v2524_v34 }
 0x1f9   : > { %2529 = vlog2.f32 %v982_v7  ;;  %1026 = vxpose.xlu0.b32.cont [7/16] %v1001_v25, 128 }
 0x1fa   : > { %2531 = vlog2.f32 %v983_v33 }
 0x1fc   : > { %v2352_v37 = vpop.f32.mrf.mxu1 }
 0x1fd   : > { %1027 = vxpose.xlu0.b32.cont [8/16] %v1003_v35, 128  ;;  %v985_v40 = vmax.f32 %v2352_v37, 1e-05 }
 0x1fe   : > { %v2526_v38 = vpop.eup %2525  ;;  %v953_v39 = vpop.f32.mrf.mxu1 }
 0x1ff   : > { %v984_v41 = vmax.f32 %v953_v39, 1e-05  ;;  %v1005_v8 = vmul.f32 0.6931472, %v2526_v38  ;;  %v2528_v42 = vpop.eup %2527 }
 0x200   : > { %v1007_v9 = vmul.f32 0.6931472, %v2528_v42 }
 0x201   : > { %2533 = vlog2.f32 %v984_v41  ;;  %1028 = vxpose.xlu0.b32.cont [9/16] %v1005_v8, 128 }
 0x202   : > { %2535 = vlog2.f32 %v985_v40 }
 0x204   : > { %v2355_v36 = vpop.f32.mrf.mxu1 }
 0x205   : > { %1029 = vxpose.xlu0.b32.cont [10/16] %v1007_v9, 128  ;;  %v987_v45 = vmax.f32 %v2355_v36, 1e-05 }
 0x206   : > { %v2530_v43 = vpop.eup %2529  ;;  %v963_v44 = vpop.f32.mrf.mxu1 }
 0x207   : > { %v986_v46 = vmax.f32 %v963_v44, 1e-05  ;;  %v1009_v48 = vmul.f32 0.6931472, %v2530_v43  ;;  %v2532_v49 = vpop.eup %2531 }
 0x208   : > { %v1150_v50 = vpop.f32.mrf.mxu1  ;;  %v1011_v47 = vmul.f32 0.6931472, %v2532_v49 }
 0x209   : > { %2537 = vlog2.f32 %v986_v46  ;;  %1030 = vxpose.xlu0.b32.cont [11/16] %v1009_v48, 128  ;;  %v1229_v51 = vmul.f32 %v1150_v50, %v1150_v50 }
 0x20a   : > { %v1152_v10 = vpop.f32.mrf.mxu1  ;;  %2539 = vlog2.f32 %v987_v45 }
 0x20b   : > { %v1245_v11 = vmul.f32 %v1152_v10, %v1152_v10 }
 0x20c   : > { %v1154_v52 = vpop.f32.mrf.mxu1 }
 0x20d   : > { %v1261_v53 = vadd.f32 %v1245_v11, %v1229_v51  ;;  %1031 = vxpose.xlu0.b32.cont [12/16] %v1011_v47, 128  ;;  %v1230_v57 = vmul.f32 %v1154_v52, %v1154_v52 }
 0x20e   : > { %v2534_v55 = vpop.eup %2533  ;;  %v1156_v54 = vpop.f32.mrf.mxu1 }
 0x20f   : > { %v1277_v56 = vadd.f32 1e-24, %v1261_v53  ;;  %v1246_v59 = vmul.f32 %v1156_v54, %v1156_v54  ;;  %v1013_v13 = vmul.f32 0.6931472, %v2534_v55  ;;  %v2536_v61 = vpop.eup %2535 }
 0x210   : > { %v1160_v14 = vpop.f32.mrf.mxu1  ;;  %v1015_v60 = vmul.f32 0.6931472, %v2536_v61 }
 0x211   : > { %2541 = vrsqrt.f32 %v1277_v56  ;;  %v1262_v58 = vadd.f32 %v1246_v59, %v1230_v57  ;;  %1032 = vxpose.xlu0.b32.cont [13/16] %v1013_v13, 128  ;;  %v1231_v1 = vmul.f32 %v1160_v14, %v1160_v14  ;;  %vm1295_vm0 = vcmp.eq.f32.partialorder %v1277_v56, inf }
 0x212   : > { %v1162_v62 = vpop.f32.mrf.mxu1  ;;  %v1298_v25 = vand.u32 2147483648, %v1277_v56  ;;  %vm1297_vm1 = vcmp.eq.f32.partialorder %v1277_v56, 0.0 }
 0x213   : > { %v1278_v63 = vadd.f32 1e-24, %v1262_v58  ;;  %v1247_v3 = vmul.f32 %v1162_v62, %v1162_v62 }
 0x214   : > { %v1164_v0 = vpop.f32.mrf.mxu1 }
 0x215   : > { %2543 = vrsqrt.f32 %v1278_v63  ;;  %v1263_v2 = vadd.f32 %v1247_v3, %v1231_v1  ;;  %1033 = vxpose.xlu0.b32.cont [14/16] %v1015_v60, 128  ;;  %v1232_v20 = vmul.f32 %v1164_v0, %v1164_v0  ;;  %vm1302_vm2 = vcmp.eq.f32.partialorder %v1278_v63, inf }
 0x216   : > { %v2538_v12 = vpop.eup %2537  ;;  %v1166_v19 = vpop.f32.mrf.mxu1  ;;  %v1305_v36 = vand.u32 2147483648, %v1278_v63  ;;  %vm1304_vm3 = vcmp.eq.f32.partialorder %v1278_v63, 0.0 }
 0x217   : > { %v2972_v15 = vadd.f32 1e-24, %v1263_v2  ;;  %v1248_v16 = vmul.f32 %v1166_v19, %v1166_v19  ;;  %v1017_v21 = vmul.f32 0.6931472, %v2538_v12  ;;  %v2540_v22 = vpop.eup %2539 }
 0x218   : > { %v1170_v23 = vpop.f32.mrf.mxu1  ;;  %v1019_v17 = vmul.f32 0.6931472, %v2540_v22 }
 0x219   : > { %2545 = vrsqrt.f32 %v2972_v15  ;;  %v1264_v4 = vadd.f32 %v1248_v16, %v1232_v20  ;;  %1034 = vxpose.xlu0.b32.cont [15/16] %v1017_v21, 128  ;;  %v1233_v18 = vmul.f32 %v1170_v23, %v1170_v23  ;;  %vm1309_vm4 = vcmp.eq.f32.partialorder %v2972_v15, inf }
 0x21a   : > { %v1172_v24 = vpop.f32.mrf.mxu1  ;;  %v1312_v47 = vand.u32 2147483648, %v2972_v15  ;;  %vm1311_vm5 = vcmp.eq.f32.partialorder %v2972_v15, 0.0 }
 0x21b   : > { %v2975_v5 = vadd.f32 1e-24, %v1264_v4  ;;  %v1249_v26 = vmul.f32 %v1172_v24, %v1172_v24 }
 0x21c   : > { %v1174_v27 = vpop.f32.mrf.mxu1 }
 0x21d   : > { %2547 = vrsqrt.f32 %v2975_v5  ;;  %v1265_v28 = vadd.f32 %v1249_v26, %v1233_v18  ;;  %1035 = vxpose.xlu0.b32.end [16/16] %v1019_v17, 128  ;;  %v1234_v32 = vmul.f32 %v1174_v27, %v1174_v27  ;;  %vm1316_vm6 = vcmp.eq.f32.partialorder %v2975_v5, inf }
 0x21e   : > { %v2542_v29 = vpop.eup %2541  ;;  %v1176_v30 = vpop.f32.mrf.mxu1  ;;  %v1319_v58 = vand.u32 2147483648, %v2975_v5  ;;  %vm1318_vm7 = vcmp.eq.f32.partialorder %v2975_v5, 0.0 }
 0x21f   : > { %v2978_v31 = vadd.f32 1e-24, %v1265_v28  ;;  %v1250_v6 = vmul.f32 %v1176_v30, %v1176_v30  ;;  %v1294_v33 = vmul.f32 %v2542_v29, %v1277_v56 }
 0x220   : > { %v1180_v7 = vpop.f32.mrf.mxu1 }
 0x221   : > { %2549 = vrsqrt.f32 %v2978_v31  ;;  %v1266_v34 = vadd.f32 %v1250_v6, %v1234_v32  ;;  %v1296_v35 = vsel %vm1295_vm0, %v1277_v56, %v1294_v33  ;;  %v1235_v41 = vmul.f32 %v1180_v7, %v1180_v7 }
 0x222   : > { %v2544_v37 = vpop.eup %2543  ;;  %v1182_v38 = vpop.f32.mrf.mxu1  ;;  %v1299_v39 = vsel %vm1297_vm1, %v1298_v25, %v1296_v35  ;;  %vm1323_vm8 = vcmp.eq.f32.partialorder %v2978_v31, inf  ;;  %v1326_v20 = vand.u32 2147483648, %v2978_v31  ;;  %vm1325_vm9 = vcmp.eq.f32.partialorder %v2978_v31, 0.0 }
 0x223   : > { %v2981_v40 = vadd.f32 1e-24, %v1266_v34  ;;  %v1251_v8 = vmul.f32 %v1182_v38, %v1182_v38  ;;  %2388 = vmatprep.mubr.f32.mxu0 %v1299_v39  ;;  %v1301_v42 = vmul.f32 %v2544_v37, %v1278_v63 }
 0x224   : > { %v1184_v9 = vpop.f32.mrf.mxu1 }
 0x225   : > { %2551 = vrsqrt.f32 %v2981_v40  ;;  %v1267_v43 = vadd.f32 %v1251_v8, %v1235_v41  ;;  %v1303_v44 = vsel %vm1302_vm2, %v1278_v63, %v1301_v42  ;;  %v1236_v50 = vmul.f32 %v1184_v9, %v1184_v9 }
 0x226   : > { %v2546_v45 = vpop.eup %2545  ;;  %v1186_v46 = vpop.f32.mrf.mxu1  ;;  %v1306_v48 = vsel %vm1304_vm3, %v1305_v36, %v1303_v44  ;;  %vm1330_vm10 = vcmp.eq.f32.partialorder %v2981_v40, inf  ;;  %v1333_v27 = vand.u32 2147483648, %v2981_v40  ;;  %vm1332_vm11 = vcmp.eq.f32.partialorder %v2981_v40, 0.0 }
 0x227   : > { %v2984_v49 = vadd.f32 1e-24, %v1267_v43  ;;  %v1252_v10 = vmul.f32 %v1186_v46, %v1186_v46  ;;  %2389 = vmatmul.mubr.f32.vlgmr.msra.gmra.mxu0 %v1306_v48  ;;  %v1308_v51 = vmul.f32 %v2546_v45, %v2972_v15 }
 0x228   : > { %v1190_v11 = vpop.f32.mrf.mxu1 }
 0x229   : > { %2553 = vrsqrt.f32 %v2984_v49  ;;  %v1268_v52 = vadd.f32 %v1252_v10, %v1236_v50  ;;  %v1310_v53 = vsel %vm1309_vm4, %v2972_v15, %v1308_v51  ;;  %v1237_v59 = vmul.f32 %v1190_v11, %v1190_v11 }
 0x22a   : > { %v2548_v55 = vpop.eup %2547  ;;  %v1192_v54 = vpop.f32.mrf.mxu1  ;;  %v1313_v56 = vsel %vm1311_vm5, %v1312_v47, %v1310_v53  ;;  %vm1337_vm12 = vcmp.eq.f32.partialorder %v2984_v49, inf  ;;  %v1340_v35 = vand.u32 2147483648, %v2984_v49  ;;  %vm1339_vm13 = vcmp.eq.f32.partialorder %v2984_v49, 0.0 }
 0x22b   : > { %v2992_v57 = vadd.f32 1e-24, %v1268_v52  ;;  %v1253_v13 = vmul.f32 %v1192_v54, %v1192_v54  ;;  %2391 = vmatprep.mubr.f32.mxu0 %v1313_v56  ;;  %v1315_v61 = vmul.f32 %v2548_v55, %v2975_v5 }
 0x22c   : > { %v1194_v14 = vpop.f32.mrf.mxu1 }
 0x22d   : > { %2555 = vrsqrt.f32 %v2992_v57  ;;  %v1269_v62 = vadd.f32 %v1253_v13, %v1237_v59  ;;  %v1317_v63 = vsel %vm1316_vm6, %v2975_v5, %v1315_v61  ;;  %v1238_v2 = vmul.f32 %v1194_v14, %v1194_v14 }
 0x22e   : > { %v2550_v1 = vpop.eup %2549  ;;  %v1196_v3 = vpop.f32.mrf.mxu1  ;;  %v1320_v60 = vsel %vm1318_vm7, %v1319_v58, %v1317_v63  ;;  %vm1344_vm14 = vcmp.eq.f32.partialorder %v2992_v57, inf  ;;  %v1347_v44 = vand.u32 2147483648, %v2992_v57  ;;  %vm1346_vm15 = vcmp.eq.f32.partialorder %v2992_v57, 0.0 }
 0x22f   : > { %v3000_v0 = vadd.f32 1e-24, %v1269_v62  ;;  %v1254_v12 = vmul.f32 %v1196_v3, %v1196_v3  ;;  %2392 = vmatmul.mubr.f32.gmra.mxu0 %v1320_v60  ;;  %v1322_v19 = vmul.f32 %v2550_v1, %v2978_v31 }
 0x230   : > { %v1200_v15 = vpop.f32.mrf.mxu1 }
 0x231   : > { %2557 = vrsqrt.f32 %v3000_v0  ;;  %v1270_v16 = vadd.f32 %v1254_v12, %v1238_v2  ;;  %v1324_v21 = vsel %vm1323_vm8, %v2978_v31, %v1322_v19  ;;  %v1239_v5 = vmul.f32 %v1200_v15, %v1200_v15 }
 0x232   : > { %v2552_v22 = vpop.eup %2551  ;;  %v1202_v23 = vpop.f32.mrf.mxu1  ;;  %v1327_v4 = vsel %vm1325_vm9, %v1326_v20, %v1324_v21  ;;  %vm1351_vm0 = vcmp.eq.f32.partialorder %v3000_v0, inf  ;;  %v1354_v53 = vand.u32 2147483648, %v3000_v0  ;;  %vm1353_vm1 = vcmp.eq.f32.partialorder %v3000_v0, 0.0 }
 0x233   : > { %v3008_v24 = vadd.f32 1e-24, %v1270_v16  ;;  %v1255_v18 = vmul.f32 %v1202_v23, %v1202_v23  ;;  %2394 = vmatprep.mubr.f32.mxu0 %v1327_v4  ;;  %v1329_v26 = vmul.f32 %v2552_v22, %v2981_v40 }
 0x234   : > { %v1204_v17 = vpop.f32.mrf.mxu1 }
 0x235   : > { %2559 = vrsqrt.f32 %v3008_v24  ;;  %v1271_v28 = vadd.f32 %v1255_v18, %v1239_v5  ;;  %v1331_v29 = vsel %vm1330_vm10, %v2981_v40, %v1329_v26  ;;  %v1240_v33 = vmul.f32 %v1204_v17, %v1204_v17 }
 0x236   : > { %v2554_v30 = vpop.eup %2553  ;;  %v1206_v31 = vpop.f32.mrf.mxu1  ;;  %v1334_v32 = vsel %vm1332_vm11, %v1333_v27, %v1331_v29  ;;  %vm1358_vm2 = vcmp.eq.f32.partialorder %v3008_v24, inf  ;;  %v1361_v63 = vand.u32 2147483648, %v3008_v24  ;;  %vm1360_vm3 = vcmp.eq.f32.partialorder %v3008_v24, 0.0 }
 0x237   : > { %v3016_v6 = vadd.f32 1e-24, %v1271_v28  ;;  %v1256_v7 = vmul.f32 %v1206_v31, %v1206_v31  ;;  %2395 = vmatmul.mubr.f32.gmra.mxu0 %v1334_v32  ;;  %v1336_v25 = vmul.f32 %v2554_v30, %v2984_v49 }
 0x238   : > { %v1210_v34 = vpop.f32.mrf.mxu1 }
 0x239   : > { %2561 = vrsqrt.f32 %v3016_v6  ;;  %v1272_v37 = vadd.f32 %v1256_v7, %v1240_v33  ;;  %v1338_v38 = vsel %vm1337_vm12, %v2984_v49, %v1336_v25  ;;  %v1241_v42 = vmul.f32 %v1210_v34, %v1210_v34 }
 0x23a   : > { %v2556_v39 = vpop.eup %2555  ;;  %v1212_v40 = vpop.f32.mrf.mxu1  ;;  %v1341_v41 = vsel %vm1339_vm13, %v1340_v35, %v1338_v38  ;;  %vm1365_vm4 = vcmp.eq.f32.partialorder %v3016_v6, inf  ;;  %v1368_v16 = vand.u32 2147483648, %v3016_v6  ;;  %vm1367_vm5 = vcmp.eq.f32.partialorder %v3016_v6, 0.0 }
 0x23b   : > { %v3024_v8 = vadd.f32 1e-24, %v1272_v37  ;;  %v1257_v9 = vmul.f32 %v1212_v40, %v1212_v40  ;;  %2397 = vmatprep.mubr.f32.mxu0 %v1341_v41  ;;  %v1343_v36 = vmul.f32 %v2556_v39, %v2992_v57 }
 0x23c   : > { %v1214_v43 = vpop.f32.mrf.mxu1 }
 0x23d   : > { %2563 = vrsqrt.f32 %v3024_v8  ;;  %v1273_v45 = vadd.f32 %v1257_v9, %v1241_v42  ;;  %v1345_v46 = vsel %vm1344_vm14, %v2992_v57, %v1343_v36  ;;  %v1242_v51 = vmul.f32 %v1214_v43, %v1214_v43 }
 0x23e   : > { %v2558_v48 = vpop.eup %2557  ;;  %v1216_v49 = vpop.f32.mrf.mxu1  ;;  %v1348_v50 = vsel %vm1346_vm15, %v1347_v44, %v1345_v46  ;;  %vm1372_vm6 = vcmp.eq.f32.partialorder %v3024_v8, inf  ;;  %v1375_v18 = vand.u32 2147483648, %v3024_v8  ;;  %vm1374_vm7 = vcmp.eq.f32.partialorder %v3024_v8, 0.0 }
 0x23f   : > { %v1289_v10 = vadd.f32 1e-24, %v1273_v45  ;;  %v1258_v11 = vmul.f32 %v1216_v49, %v1216_v49  ;;  %2398 = vmatmul.mubr.f32.gmra.mxu0 %v1348_v50  ;;  %v1350_v47 = vmul.f32 %v2558_v48, %v3000_v0 }
 0x240   : > { %v1220_v52 = vpop.f32.mrf.mxu1 }
 0x241   : > { %2565 = vrsqrt.f32 %v1289_v10  ;;  %v1274_v55 = vadd.f32 %v1258_v11, %v1242_v51  ;;  %v1352_v54 = vsel %vm1351_vm0, %v3000_v0, %v1350_v47  ;;  %v1243_v61 = vmul.f32 %v1220_v52, %v1220_v52 }
 0x242   : > { %v2560_v56 = vpop.eup %2559  ;;  %v1222_v57 = vpop.f32.mrf.mxu1  ;;  %v1355_v59 = vsel %vm1353_vm1, %v1354_v53, %v1352_v54  ;;  %vm1379_vm8 = vcmp.eq.f32.partialorder %v1289_v10, inf  ;;  %v1382_v29 = vand.u32 2147483648, %v1289_v10  ;;  %vm1381_vm9 = vcmp.eq.f32.partialorder %v1289_v10, 0.0 }
 0x243   : > { %v1290_v13 = vadd.f32 1e-24, %v1274_v55  ;;  %v1259_v14 = vmul.f32 %v1222_v57, %v1222_v57  ;;  %2400 = vmatprep.mubr.f32.mxu0 %v1355_v59  ;;  %v1357_v58 = vmul.f32 %v2560_v56, %v3008_v24 }
 0x244   : > { %v1224_v62 = vpop.f32.mrf.mxu1 }
 0x245   : > { %2567 = vrsqrt.f32 %v1290_v13  ;;  %v1275_v1 = vadd.f32 %v1259_v14, %v1243_v61  ;;  %v1359_v3 = vsel %vm1358_vm2, %v3008_v24, %v1357_v58  ;;  %v1244_v19 = vmul.f32 %v1224_v62, %v1224_v62 }
 0x246   : > { %v2562_v60 = vpop.eup %2561  ;;  %v1226_v0 = vpop.f32.mrf.mxu1  ;;  %v1362_v2 = vsel %vm1360_vm3, %v1361_v63, %v1359_v3  ;;  %vm1386_vm10 = vcmp.eq.f32.partialorder %v1290_v13, inf  ;;  %v1389_v33 = vand.u32 2147483648, %v1290_v13  ;;  %vm1388_vm11 = vcmp.eq.f32.partialorder %v1290_v13, 0.0 }
 0x247   : > { %v1291_v12 = vadd.f32 1e-24, %v1275_v1  ;;  %v1260_v15 = vmul.f32 %v1226_v0, %v1226_v0  ;;  %2401 = vmatmul.mubr.f32.gmra.mxu0 %v1362_v2  ;;  %v1364_v20 = vmul.f32 %v2562_v60, %v3016_v6 }
 0x249   : > { %2569 = vrsqrt.f32 %v1291_v12  ;;  %v1276_v21 = vadd.f32 %v1260_v15, %v1244_v19  ;;  %v1366_v22 = vsel %vm1365_vm4, %v3016_v6, %v1364_v20  ;;  %vm1393_vm12 = vcmp.eq.f32.partialorder %v1291_v12, inf }
 0x24a   : > { %v2564_v23 = vpop.eup %2563  ;;  %v1369_v4 = vsel %vm1367_vm5, %v1368_v16, %v1366_v22  ;;  %v1396_v37 = vand.u32 2147483648, %v1291_v12  ;;  %vm1395_vm13 = vcmp.eq.f32.partialorder %v1291_v12, 0.0 }
 0x24b   : > { %v1292_v24 = vadd.f32 1e-24, %v1276_v21  ;;  %2403 = vmatprep.mubr.f32.mxu0 %v1369_v4  ;;  %v1371_v5 = vmul.f32 %v2564_v23, %v3024_v8 }
 0x24d   : > { %2571 = vrsqrt.f32 %v1292_v24  ;;  %v1373_v26 = vsel %vm1372_vm6, %v3024_v8, %v1371_v5  ;;  %vm1400_vm14 = vcmp.eq.f32.partialorder %v1292_v24, inf  ;;  %v1403_v8 = vand.u32 2147483648, %v1292_v24 }
 0x24e   : > { %v2566_v17 = vpop.eup %2565  ;;  %v1376_v27 = vsel %vm1374_vm7, %v1375_v18, %v1373_v26  ;;  %vm1402_vm15 = vcmp.eq.f32.partialorder %v1292_v24, 0.0 }
 0x24f   : > { %2404 = vmatmul.mubr.f32.gmra.mxu0 %v1376_v27  ;;  %v1378_v28 = vmul.f32 %v2566_v17, %v1289_v10 }
 0x251   : > { %v1380_v30 = vsel %vm1379_vm8, %v1289_v10, %v1378_v28 }
 0x252   : > { %v2568_v31 = vpop.eup %2567  ;;  %v1383_v32 = vsel %vm1381_vm9, %v1382_v29, %v1380_v30 }
 0x253   : > { %2406 = vmatprep.mubr.f32.mxu0 %v1383_v32  ;;  %v1385_v6 = vmul.f32 %v2568_v31, %v1290_v13 }
 0x255   : > { %v1387_v7 = vsel %vm1386_vm10, %v1290_v13, %v1385_v6 }
 0x256   : > { %v2570_v25 = vpop.eup %2569  ;;  %v1390_v34 = vsel %vm1388_vm11, %v1389_v33, %v1387_v7 }
 0x257   : > { %2407 = vmatmul.mubr.f32.gmra.mxu0 %v1390_v34  ;;  %v1392_v35 = vmul.f32 %v2570_v25, %v1291_v12 }
 0x259   : > { %v1394_v38 = vsel %vm1393_vm12, %v1291_v12, %v1392_v35 }
 0x25a   : > { %v2572_v39 = vpop.eup %2571  ;;  %v1397_v40 = vsel %vm1395_vm13, %v1396_v37, %v1394_v38 }
 0x25b   : > { %2409 = vmatprep.mubr.f32.mxu0 %v1397_v40  ;;  %v1399_v41 = vmul.f32 %v2572_v39, %v1292_v24 }
 0x25d   : > { %v1401_v42 = vsel %vm1400_vm14, %v1292_v24, %v1399_v41  ;;  %v3052_v10 = vpop.trf.xlu0 }
 0x25e   : > { %v1404_v9 = vsel %vm1402_vm15, %v1403_v8, %v1401_v42 }
 0x25f   : > { %2410 = vmatmul.mubr.f32.gmra.mxu0 %v1404_v9 }
 0x261   : > { %v3054_v52 = vpop.trf.xlu0 }
 0x262   : > { %v2145_v56 = vpack.c.bf16 %v3054_v52, %v3052_v10 }
 0x264   : > { %2146 = vst [vmem:[%s3062_s17] sm:$0xff] %v2145_v56  }
 0x265   : > { %v3065_v59 = vpop.trf.xlu0 }
 0x269   : > { %v3067_v62 = vpop.trf.xlu0 }
 0x26a   : > { %v2150_v60 = vpack.c.bf16 %v3067_v62, %v3065_v59 }
 0x26c   : > { %2222 = vst [vmem:[%s3062_s17 + $0x8] sm:$0xff] %v2150_v60  }
 0x26d   : > { %v3072_v2 = vpop.trf.xlu0 }
 0x271   : > { %v3074_v16 = vpop.trf.xlu0 }
 0x272   : > { %v2155_v4 = vpack.c.bf16 %v3074_v16, %v3072_v2 }
 0x274   : > { %2223 = vst [vmem:[%s3062_s17 + $0x10] sm:$0xff] %v2155_v4  }
 0x275   : > { %v3079_v5 = vpop.trf.xlu0 }
 0x279   : > { %v3081_v28 = vpop.trf.xlu0 }
 0x27a   : > { %v2160_v32 = vpack.c.bf16 %v3081_v28, %v3079_v5 }
 0x27c   : > { %2224 = vst [vmem:[%s3062_s17 + $0x18] sm:$0xff] %v2160_v32  }
 0x27d   : > { %v3086_v33 = vpop.trf.xlu0 }
 0x281   : > { %v3088_v37 = vpop.trf.xlu0 }
 0x282   : > { %v2165_v41 = vpack.c.bf16 %v3088_v37, %v3086_v33 }
 0x284   : > { %2225 = vst [vmem:[%s3062_s17 + $0x20] sm:$0xff] %v2165_v41  }
 0x285   : > { %v3093_v42 = vpop.trf.xlu0 }
 0x2e7   : > { %v2390_v36 = vpop.f32.mrf.mxu0 }
 0x2e8   : > { %v1551_v44 = vmax.f32 %v2390_v36, 1e-05 }
 0x2e9   : > { %v1471_v43 = vpop.f32.mrf.mxu0 }
 0x2ea   : > { %v1550_v45 = vmax.f32 %v1471_v43, 1e-05 }
 0x2ec   : > { %2573 = vlog2.f32 %v1550_v45  ;;  %v3095_v45 = vpop.trf.xlu0 }
 0x2ed   : > { %2575 = vlog2.f32 %v1551_v44 }
 0x2ef   : > { %v2393_v46 = vpop.f32.mrf.mxu0 }
 0x2f0   : > { %v1553_v49 = vmax.f32 %v2393_v46, 1e-05 }
 0x2f1   : > { %v1481_v48 = vpop.f32.mrf.mxu0 }
 0x2f2   : > { %v1552_v50 = vmax.f32 %v1481_v48, 1e-05 }
 0x2f4   : > { %2577 = vlog2.f32 %v1552_v50  ;;  %v2170_v50 = vpack.c.bf16 %v3095_v45, %v3093_v42 }
 0x2f5   : > { %2579 = vlog2.f32 %v1553_v49 }
 0x2f6   : > { %2226 = vst [vmem:[%s3062_s17 + $0x28] sm:$0xff] %v2170_v50  }
 0x2f7   : > { %v2396_v51 = vpop.f32.mrf.mxu0 }
 0x2f8   : > { %v1555_v53 = vmax.f32 %v2396_v51, 1e-05 }
 0x2f9   : > { %v2574_v11 = vpop.eup %2573  ;;  %v1491_v47 = vpop.f32.mrf.mxu0 }
 0x2fa   : > { %v1554_v55 = vmax.f32 %v1491_v47, 1e-05  ;;  %v1567_v54 = vmul.f32 0.6931472, %v2574_v11  ;;  %v2576_v57 = vpop.eup %2575  ;;  %v3100_v11 = vpop.trf.xlu0 }
 0x2fb   : > { %v1569_v13 = vmul.f32 0.6931472, %v2576_v57 }
 0x2fc   : > { %2581 = vlog2.f32 %v1554_v55  ;;  %1598 = vxpose.xlu1.b32.start [1/16] %v1567_v54, 128 }
 0x2fd   : > { %2583 = vlog2.f32 %v1555_v53 }
 0x2fe   : > { %v3102_v55 = vpop.trf.xlu0 }
 0x2ff   : > { %v2399_v61 = vpop.f32.mrf.mxu0  ;;  %v2175_v56 = vpack.c.bf16 %v3102_v55, %v3100_v11 }
 0x300   : > { %1599 = vxpose.xlu1.b32.cont [2/16] %v1569_v13, 128  ;;  %v1557_v63 = vmax.f32 %v2399_v61, 1e-05 }
 0x301   : > { %v2578_v14 = vpop.eup %2577  ;;  %v1501_v58 = vpop.f32.mrf.mxu0  ;;  %2227 = vst [vmem:[%s3062_s17 + $0x30] sm:$0xff] %v2175_v56  }
 0x302   : > { %v1556_v1 = vmax.f32 %v1501_v58, 1e-05  ;;  %v1571_v3 = vmul.f32 0.6931472, %v2578_v14  ;;  %v2580_v0 = vpop.eup %2579  ;;  %v3107_v13 = vpop.trf.xlu0 }
 0x303   : > { %v1573_v12 = vmul.f32 0.6931472, %v2580_v0 }
 0x304   : > { %2585 = vlog2.f32 %v1556_v1  ;;  %1600 = vxpose.xlu1.b32.cont [3/16] %v1571_v3, 128 }
 0x305   : > { %2587 = vlog2.f32 %v1557_v63 }
 0x306   : > { %v3109_v58 = vpop.trf.xlu0 }
 0x307   : > { %v2402_v19 = vpop.f32.mrf.mxu0  ;;  %v2180_v1 = vpack.c.bf16 %v3109_v58, %v3107_v13 }
 0x308   : > { %1601 = vxpose.xlu1.b32.cont [4/16] %v1573_v12, 128  ;;  %v1559_v21 = vmax.f32 %v2402_v19, 1e-05 }
 0x309   : > { %v2582_v15 = vpop.eup %2581  ;;  %v1511_v20 = vpop.f32.mrf.mxu0  ;;  %2228 = vst [vmem:[%s3062_s17 + $0x38] sm:$0xff] %v2180_v1  }
 0x30a   : > { %v1558_v22 = vmax.f32 %v1511_v20, 1e-05  ;;  %v1575_v23 = vmul.f32 0.6931472, %v2582_v15  ;;  %v2584_v24 = vpop.eup %2583 }
 0x30b   : > { %v1577_v18 = vmul.f32 0.6931472, %v2584_v24 }
 0x30c   : > { %2589 = vlog2.f32 %v1558_v22  ;;  %1602 = vxpose.xlu1.b32.cont [5/16] %v1575_v23, 128 }
 0x30d   : > { %2591 = vlog2.f32 %v1559_v21 }
 0x30f   : > { %v2405_v26 = vpop.f32.mrf.mxu0 }
 0x310   : > { %1603 = vxpose.xlu1.b32.cont [6/16] %v1577_v18, 128  ;;  %v1561_v29 = vmax.f32 %v2405_v26, 1e-05 }
 0x311   : > { %v2586_v17 = vpop.eup %2585  ;;  %v1521_v27 = vpop.f32.mrf.mxu0 }
 0x312   : > { %v1560_v30 = vmax.f32 %v1521_v27, 1e-05  ;;  %v1579_v31 = vmul.f32 0.6931472, %v2586_v17  ;;  %v2588_v6 = vpop.eup %2587 }
 0x313   : > { %v1581_v7 = vmul.f32 0.6931472, %v2588_v6 }
 0x314   : > { %2593 = vlog2.f32 %v1560_v30  ;;  %1604 = vxpose.xlu1.b32.cont [7/16] %v1579_v31, 128 }
 0x315   : > { %2595 = vlog2.f32 %v1561_v29 }
 0x317   : > { %v2408_v25 = vpop.f32.mrf.mxu0 }
 0x318   : > { %1605 = vxpose.xlu1.b32.cont [8/16] %v1581_v7, 128  ;;  %v1563_v38 = vmax.f32 %v2408_v25, 1e-05 }
 0x319   : > { %v2590_v34 = vpop.eup %2589  ;;  %v1531_v35 = vpop.f32.mrf.mxu0 }
 0x31a   : > { %v1562_v39 = vmax.f32 %v1531_v35, 1e-05  ;;  %v1583_v40 = vmul.f32 0.6931472, %v2590_v34  ;;  %v2592_v8 = vpop.eup %2591 }
 0x31b   : > { %v1585_v9 = vmul.f32 0.6931472, %v2592_v8 }
 0x31c   : > { %2597 = vlog2.f32 %v1562_v39  ;;  %1606 = vxpose.xlu1.b32.cont [9/16] %v1583_v40, 128 }
 0x31d   : > { %2599 = vlog2.f32 %v1563_v38 }
 0x31f   : > { %v2411_v36 = vpop.f32.mrf.mxu0 }
 0x320   : > { %1607 = vxpose.xlu1.b32.cont [10/16] %v1585_v9, 128  ;;  %v1565_v46 = vmax.f32 %v2411_v36, 1e-05 }
 0x321   : > { %v2594_v43 = vpop.eup %2593  ;;  %v1541_v44 = vpop.f32.mrf.mxu0 }
 0x322   : > { %v1564_v48 = vmax.f32 %v1541_v44, 1e-05  ;;  %v1587_v49 = vmul.f32 0.6931472, %v2594_v43  ;;  %v2596_v51 = vpop.eup %2595 }
 0x323   : > { %v1589_v47 = vmul.f32 0.6931472, %v2596_v51 }
 0x324   : > { %2601 = vlog2.f32 %v1564_v48  ;;  %1608 = vxpose.xlu1.b32.cont [11/16] %v1587_v49, 128 }
 0x325   : > { %2603 = vlog2.f32 %v1565_v46 }
 0x328   : > { %1609 = vxpose.xlu1.b32.cont [12/16] %v1589_v47, 128 }
 0x329   : > { %v2598_v53 = vpop.eup %2597 }
 0x32a   : > { %v1591_v54 = vmul.f32 0.6931472, %v2598_v53  ;;  %v2600_v57 = vpop.eup %2599 }
 0x32b   : > { %v1593_v61 = vmul.f32 0.6931472, %v2600_v57 }
 0x32c   : > { %1610 = vxpose.xlu1.b32.cont [13/16] %v1591_v54, 128 }
 0x330   : > { %1611 = vxpose.xlu1.b32.cont [14/16] %v1593_v61, 128 }
 0x331   : > { %v2602_v14 = vpop.eup %2601 }
 0x332   : > { %v1595_v63 = vmul.f32 0.6931472, %v2602_v14  ;;  %v2604_v3 = vpop.eup %2603 }
 0x333   : > { %v1597_v60 = vmul.f32 0.6931472, %v2604_v3 }
 0x334   : > { %1612 = vxpose.xlu1.b32.cont [15/16] %v1595_v63, 128 }
 0x338   : > { %1613 = vxpose.xlu1.b32.end [16/16] %v1597_v60, 128 }
 0x378   : > { %v1614_v0 = vpop.trf.xlu1 }
 0x379   : > { %v1790_v27 = vsub.f32 %v3052_v10, %v1614_v0 }
 0x37b   : > { %v1806_v6 = vand.u32 2147483647, %v1790_v27 }
 0x37c   : > { %v1615_v12 = vpop.trf.xlu1 }
 0x37d   : > { %v2185_v19 = vpack.c.bf16 %v1615_v12, %v1614_v0  ;;  %v1791_v26 = vsub.f32 %v3054_v52, %v1615_v12 }
 0x37f   : > { %2186 = vst [vmem:[%s3118_s25] sm:$0xff] %v2185_v19   ;;  %v1807_v31 = vand.u32 2147483647, %v1791_v26 }
 0x380   : > { %v1616_v15 = vpop.trf.xlu1 }
 0x381   : > { %v1792_v29 = vsub.f32 %v3065_v59, %v1616_v15  ;;  %v1822_v35 = vadd.f32 %v1807_v31, %v1806_v6 }
 0x383   : > { %v1808_v7 = vand.u32 2147483647, %v1792_v29 }
 0x384   : > { %v1617_v20 = vpop.trf.xlu1 }
 0x385   : > { %v2190_v21 = vpack.c.bf16 %v1617_v20, %v1616_v15  ;;  %v1793_v32 = vsub.f32 %v3067_v62, %v1617_v20  ;;  %v1823_v40 = vadd.f32 %v1822_v35, %v1808_v7 }
 0x387   : > { %2229 = vst [vmem:[%s3118_s25 + $0x8] sm:$0xff] %v2190_v21   ;;  %v1809_v38 = vand.u32 2147483647, %v1793_v32 }
 0x388   : > { %v1618_v22 = vpop.trf.xlu1 }
 0x389   : > { %v1794_v25 = vsub.f32 %v3072_v2, %v1618_v22  ;;  %v1824_v8 = vadd.f32 %v1823_v40, %v1809_v38 }
 0x38b   : > { %v1810_v10 = vand.u32 2147483647, %v1794_v25 }
 0x38c   : > { %v1619_v23 = vpop.trf.xlu1 }
 0x38d   : > { %v2195_v4 = vpack.c.bf16 %v1619_v23, %v1618_v22  ;;  %v1795_v52 = vsub.f32 %v3074_v16, %v1619_v23  ;;  %v1825_v36 = vadd.f32 %v1824_v8, %v1810_v10 }
 0x38f   : > { %2230 = vst [vmem:[%s3118_s25 + $0x10] sm:$0xff] %v2195_v4   ;;  %v1811_v9 = vand.u32 2147483647, %v1795_v52 }
 0x390   : > { %v1620_v24 = vpop.trf.xlu1 }
 0x391   : > { %v1796_v59 = vsub.f32 %v3079_v5, %v1620_v24  ;;  %v1826_v46 = vadd.f32 %v1825_v36, %v1811_v9 }
 0x393   : > { %v1812_v43 = vand.u32 2147483647, %v1796_v59 }
 0x394   : > { %v1621_v18 = vpop.trf.xlu1 }
 0x395   : > { %v2200_v17 = vpack.c.bf16 %v1621_v18, %v1620_v24  ;;  %v1797_v62 = vsub.f32 %v3081_v28, %v1621_v18  ;;  %v1827_v50 = vadd.f32 %v1826_v46, %v1812_v43 }
 0x397   : > { %2231 = vst [vmem:[%s3118_s25 + $0x18] sm:$0xff] %v2200_v17   ;;  %v1813_v48 = vand.u32 2147483647, %v1797_v62 }
 0x398   : > { %v1622_v30 = vpop.trf.xlu1 }
 0x399   : > { %v1798_v2 = vsub.f32 %v3086_v33, %v1622_v30  ;;  %v1828_v53 = vadd.f32 %v1827_v50, %v1813_v48 }
 0x39b   : > { %v1814_v51 = vand.u32 2147483647, %v1798_v2 }
 0x39c   : > { %v1623_v34 = vpop.trf.xlu1 }
 0x39d   : > { %v2205_v39 = vpack.c.bf16 %v1623_v34, %v1622_v30  ;;  %v1799_v16 = vsub.f32 %v3088_v37, %v1623_v34  ;;  %v1829_v56 = vadd.f32 %v1828_v53, %v1814_v51 }
 0x39f   : > { %2232 = vst [vmem:[%s3118_s25 + $0x20] sm:$0xff] %v2205_v39   ;;  %v1815_v54 = vand.u32 2147483647, %v1799_v16 }
 0x3a0   : > { %v1624_v41 = vpop.trf.xlu1 }
 0x3a1   : > { %v1800_v5 = vsub.f32 %v3093_v42, %v1624_v41  ;;  %v1830_v14 = vadd.f32 %v1829_v56, %v1815_v54 }
 0x3a3   : > { %v1816_v57 = vand.u32 2147483647, %v1800_v5 }
 0x3a4   : > { %v1625_v44 = vpop.trf.xlu1 }
 0x3a5   : > { %v2210_v49 = vpack.c.bf16 %v1625_v44, %v1624_v41  ;;  %v1801_v28 = vsub.f32 %v3095_v45, %v1625_v44  ;;  %v1831_v3 = vadd.f32 %v1830_v14, %v1816_v57 }
 0x3a7   : > { %2233 = vst [vmem:[%s3118_s25 + $0x28] sm:$0xff] %v2210_v49   ;;  %v1817_v63 = vand.u32 2147483647, %v1801_v28 }
 0x3a8   : > { %v1626_v47 = vpop.trf.xlu1 }
 0x3a9   : > { %v1802_v33 = vsub.f32 %v3100_v11, %v1626_v47  ;;  %v1832_v0 = vadd.f32 %v1831_v3, %v1817_v63 }
 0x3ab   : > { %v1818_v42 = vand.u32 2147483647, %v1802_v33 }
 0x3ac   : > { %v1627_v61 = vpop.trf.xlu1 }
 0x3ad   : > { %v2215_v37 = vpack.c.bf16 %v1627_v61, %v1626_v47  ;;  %v1803_v1 = vsub.f32 %v3102_v55, %v1627_v61  ;;  %v1833_v45 = vadd.f32 %v1832_v0, %v1818_v42 }
 0x3af   : > { %2234 = vst [vmem:[%s3118_s25 + $0x30] sm:$0xff] %v2215_v37   ;;  %v1819_v12 = vand.u32 2147483647, %v1803_v1 }
 0x3b0   : > { %v1628_v60 = vpop.trf.xlu1 }
 0x3b1   : > { %v1804_v19 = vsub.f32 %v3107_v13, %v1628_v60  ;;  %v1834_v11 = vadd.f32 %v1833_v45, %v1819_v12 }
 0x3b3   : > { %v1820_v15 = vand.u32 2147483647, %v1804_v19 }
 0x3b4   : > { %v1629_v20 = vpop.trf.xlu1 }
 0x3b5   : > { %v2220_v21 = vpack.c.bf16 %v1629_v20, %v1628_v60  ;;  %v1805_v22 = vsub.f32 %v3109_v58, %v1629_v20  ;;  %v1835_v23 = vadd.f32 %v1834_v11, %v1820_v15 }
 0x3b7   : > { %2235 = vst [vmem:[%s3118_s25 + $0x38] sm:$0xff] %v2220_v21   ;;  %v1821_v4 = vand.u32 2147483647, %v1805_v22 }
 0x3b9   : > { %v1836_v55 = vadd.f32 %v1835_v23, %v1821_v4 }
 0x3bb   : > { %v1837_v24 = vrot.slane %v1836_v55, 4 }
 0x3bd   : > { %v1838_v18 = vadd.f32 %v1837_v24, %v1836_v55 }
 0x3bf   : > { %v1839_v26 = vrot.slane %v1838_v18, 2 }
 0x3c1   : > { %v1840_v17 = vadd.f32 %v1839_v26, %v1838_v18 }
 0x3c3   : > { %v1841_v27 = vrot.slane %v1840_v17, 1 }
 0x3c5   : > { %v1842_v13 = vadd.f32 %v1841_v27, %v1840_v17 }
 0x3c7   : > { %1843 = vst [vmem:[%s360_s27] sm:$0x1] %v1842_v13 }
 0x3c8 PF: > { %s17_s23 = sadd.s32 1, %s2627_s23   ;;  %s3164_s21 = smov %s2623_s22 }
 0x3c9   : > { %p14_p5 = scmp.ge.s32.totalorder %s17_s23, 4   ;;  %s3165_s22 = smov %s3167_s24 }
 0x3cb   :  { %16 = sbr.rel (!%p14_p5) target bundleno = 2 (0x2), region = 93 }

</bundles_post_ra>
